<compile_context>
chip_gen: v7x
topology: tpu7x:2x2x1
jax: 0.10.0
libtpu: 0.0.40
codegen_flags: <defaults>
</compile_context>

<pallas_src>
import functools

import jax
import jax.numpy as jnp
import numpy as np
from jax.experimental import pallas as pl
from jax.experimental.pallas import tpu as pltpu


def _saa_kernel(nodes_ref, bias_ref, paths_ref,
                wq_ref, bq_ref, wk_ref, bk_ref, wv_ref, bv_ref,
                wsk_ref, bsk_ref, wsv_ref, bsv_ref,
                wo_ref, bo_ref, png_ref, pnb_ref, ng_ref, nb_ref,
                out_ref, *, heads):
    """One grid step == one batch element.

    nodes_ref : (1, L, H) f32
    bias_ref  : (1, 1, L) f32   additive key bias (from masking_bias)
    paths_ref : (1, L*L, P) f32 key-major flattened paths: row j*L + i == paths[i, j, :]
    weights   : pre-transposed to (in, out) so projections are plain x @ W + b
    out_ref   : (1, L, H) f32
    """
    f32 = jnp.float32
    x = nodes_ref[0]                                      # (L, H)
    L, H = x.shape
    D = H // heads

    # --- q / k / v projections (MXU) ---
    q = jnp.dot(x, wq_ref[...], preferred_element_type=f32) + bq_ref[...]
    k = jnp.dot(x, wk_ref[...], preferred_element_type=f32) + bk_ref[...]
    v = jnp.dot(x, wv_ref[...], preferred_element_type=f32) + bv_ref[...]
    q = q * (float(D) ** -0.5)

    # --- path LayerNorm + struct projections: computed ONCE, shared by all heads ---
    p = paths_ref[0]                                      # (L*L, P)
    mu = jnp.mean(p, axis=-1, keepdims=True)
    pc = p - mu
    var = jnp.mean(pc * pc, axis=-1, keepdims=True)
    p = pc * jax.lax.rsqrt(var + 1e-5) * png_ref[...] + pnb_ref[...]
    sk = jnp.dot(p, wsk_ref[...], preferred_element_type=f32) + bsk_ref[...]   # (L*L, D)
    sv = jnp.dot(p, wsv_ref[...], preferred_element_type=f32) + bsv_ref[...]   # (L*L, D)

    b_row = bias_ref[0]                                   # (1, L), broadcast over queries

    # --- attention, one head at a time (heads is small & static -> unrolled) ---
    head_outs = []
    for h in range(heads):
        qh = q[:, h * D:(h + 1) * D]                      # (L, D)
        kh = k[:, h * D:(h + 1) * D]
        vh = v[:, h * D:(h + 1) * D]

        # content scores: q_h @ k_h^T                     (L, L)
        w = jax.lax.dot_general(qh, kh, (((1,), (1,)), ((), ())),
                                preferred_element_type=f32)

        # structural key scores: w2[i, j] = <q_h[i, :], struct_k[i, j, :]>
        cols = []
        for j in range(L):
            skj = sk[j * L:(j + 1) * L, :]                # (L, D) == struct_k[:, j, :]
            cols.append(jnp.sum(qh * skj, axis=-1, keepdims=True))
        w = w + jnp.concatenate(cols, axis=1) + b_row

        # softmax over keys (numerically stable)
        w = w - jnp.max(w, axis=-1, keepdims=True)
        e = jnp.exp(w)
        w = e / jnp.sum(e, axis=-1, keepdims=True)

        # content values + structural values
        oh = jnp.dot(w, vh, preferred_element_type=f32)   # (L, D)
        for j in range(L):
            svj = sv[j * L:(j + 1) * L, :]                # (L, D) == struct_v[:, j, :]
            oh = oh + w[:, j:(j + 1)] * svj
        head_outs.append(oh)

    att = jnp.concatenate(head_outs, axis=-1)             # (L, H) == combine_heads

    # --- output projection + ReLU + residual + LayerNorm, single dense store ---
    o = jnp.dot(att, wo_ref[...], preferred_element_type=f32) + bo_ref[...]
    o = jnp.maximum(o, 0.0)
    # TODO(synk): dropout omitted (inference / eval mode -> identity).
    r = x + o
    mu = jnp.mean(r, axis=-1, keepdims=True)
    rc = r - mu
    var = jnp.mean(rc * rc, axis=-1, keepdims=True)
    y = rc * jax.lax.rsqrt(var + 1e-5) * ng_ref[...] + nb_ref[...]
    out_ref[0] = y.astype(out_ref.dtype)


@functools.partial(jax.jit, static_argnames=("head_num",))
def structure_aware_attention(nodes, bias, paths, params, *, head_num):
    """nodes (B,L,H) f32, bias (B,1,1,L) f32 (additive key bias), paths (B,L,L,P) f32.

    params = (wq, bq, wk, bk, wv, bv, wsk, bsk, wsv, bsv, wo, bo,
              path_norm_gamma, path_norm_beta, norm_gamma, norm_beta)
    with weights already in (in, out) layout and vectors shaped (1, dim).
    Returns (B, L, H) f32.
    """
    B, L, H = nodes.shape
    P = paths.shape[-1]
    D = H // head_num
    M = L * L

    # Hoisted (batch-level) layout prep: key-major flattening so the kernel can
    # take contiguous, 8-aligned (L, D) sublane slices per key index j.
    paths_t = jnp.transpose(paths, (0, 2, 1, 3)).reshape(B, M, P).astype(jnp.float32)
    bias3 = bias.reshape(B, 1, L).astype(jnp.float32)

    (wq, bq, wk, bk, wv, bv, wsk, bsk, wsv, bsv,
     wo, bo, png, pnb, ng, nb) = params

    def rep(shape):  # batch-invariant table: constant index_map -> DMA'd once
        n = len(shape)
        return pl.BlockSpec(shape, lambda *_: (0,) * n)

    kernel = functools.partial(_saa_kernel, heads=head_num)

    out = pl.pallas_call(
        kernel,
        out_shape=jax.ShapeDtypeStruct((B, L, H), jnp.float32),
        grid=(B,),
        in_specs=[
            pl.BlockSpec((1, L, H), lambda b: (b, 0, 0)),    # nodes
            pl.BlockSpec((1, 1, L), lambda b: (b, 0, 0)),    # bias row
            pl.BlockSpec((1, M, P), lambda b: (b, 0, 0)),    # paths (key-major flat)
            rep((H, H)), rep((1, H)),                        # q_transform
            rep((H, H)), rep((1, H)),                        # k_transform
            rep((H, H)), rep((1, H)),                        # v_transform
            rep((P, D)), rep((1, D)),                        # struct_k_transform
            rep((P, D)), rep((1, D)),                        # struct_v_transform
            rep((H, H)), rep((1, H)),                        # o_transform
            rep((1, P)), rep((1, P)),                        # path_norm gamma / beta
            rep((1, H)), rep((1, H)),                        # norm gamma / beta
        ],
        out_specs=pl.BlockSpec((1, L, H), lambda b: (b, 0, 0)),
        compiler_params=pltpu.CompilerParams(
            dimension_semantics=("parallel",)),
    )(nodes.astype(jnp.float32), bias3, paths_t,
      wq, bq, wk, bk, wv, bv, wsk, bsk, wsv, bsv, wo, bo, png, pnb, ng, nb)
    return out


if __name__ == "__main__":
    # small shapes consistent with the module
    B, L, H, heads, P = 2, 8, 32, 4, 16          # batch, seq, hidden, heads, path_hidden
    D = H // heads
    f32 = jnp.float32

    key = jax.random.PRNGKey(0)
    ks = jax.random.split(key, 18)

    def lin(k, fan_in, shape):
        return jax.random.normal(k, shape, f32) * (fan_in ** -0.5)

    wq = lin(ks[0], H, (H, H));  bq = lin(ks[1], H, (1, H))
    wk = lin(ks[2], H, (H, H));  bk = lin(ks[3], H, (1, H))
    wv = lin(ks[4], H, (H, H));  bv = lin(ks[5], H, (1, H))
    wsk = lin(ks[6], P, (P, D)); bsk = lin(ks[7], P, (1, D))
    wsv = lin(ks[8], P, (P, D)); bsv = lin(ks[9], P, (1, D))
    wo = lin(ks[10], H, (H, H)); bo = lin(ks[11], H, (1, H))
    png = jnp.ones((1, P), f32) + 0.1 * jax.random.normal(ks[12], (1, P), f32)
    pnb = 0.1 * jax.random.normal(ks[13], (1, P), f32)
    ng = jnp.ones((1, H), f32) + 0.1 * jax.random.normal(ks[14], (1, H), f32)
    nb = 0.1 * jax.random.normal(ks[15], (1, H), f32)
    params = (wq, bq, wk, bk, wv, bv, wsk, bsk, wsv, bsv, wo, bo, png, pnb, ng, nb)

    nodes = jax.random.normal(ks[16], (B, L, H), f32)
    paths = jax.random.normal(ks[17], (B, L, L, P), f32)

    # masking_bias: batch 0 fully valid, batch 1 has its last 2 keys masked.
    mask = jnp.arange(L)[None, :] < jnp.array([[L], [L - 2]])
    bias4 = jnp.where(mask, 0.0, -1e9).astype(f32)[:, None, None, :]   # (B,1,1,L)

    out = structure_aware_attention(nodes, bias4, paths, params, head_num=heads)
    out = jax.block_until_ready(out)

    # ---- plain-JAX reference of the PyTorch forward (eval mode) ----
    def ln_ref(xx, g, b):
        m = jnp.mean(xx, axis=-1, keepdims=True)
        c = xx - m
        vv = jnp.mean(c * c, axis=-1, keepdims=True)
        return c * jax.lax.rsqrt(vv + 1e-5) * g + b

    with jax.default_matmul_precision("highest"):
        q = nodes @ wq + bq
        k = nodes @ wk + bk
        v = nodes @ wv + bv

        def split(t):
            return t.reshape(B, L, heads, D).transpose(0, 2, 1, 3)

        qh, kh, vh = split(q) * (D ** -0.5), split(k), split(v)
        pn = ln_ref(paths, png, pnb)
        sk = pn @ wsk + bsk
        sv = pn @ wsv + bsv
        w = jnp.einsum('bhid,bhjd->bhij', qh, kh)
        w = w + jnp.einsum('bhid,bijd->bhij', qh, sk)
        w = jax.nn.softmax(w + bias4, axis=-1)
        o = jnp.einsum('bhij,bhjd->bhid', w, vh)
        o = o + jnp.einsum('bhij,bijd->bhid', w, sv)
        o = o.transpose(0, 2, 1, 3).reshape(B, L, H)
        o = jnp.maximum(o @ wo + bo, 0.0)
        ref = ln_ref(nodes + o, ng, nb)

    assert out.shape == (B, L, H), out.shape
    np.testing.assert_allclose(np.asarray(out), np.asarray(ref), rtol=1e-3, atol=1e-3)
    print("KERNEL_OK")
</pallas_src>

<mosaic_0001>
module attributes {stable_mosaic.version = 11 : i64} {
  func.func @_saa_kernel(%arg0: i32, %arg1: memref<1x8x32xf32, #tpu.memory_space<vmem>>, %arg2: memref<1x1x8xf32, #tpu.memory_space<vmem>>, %arg3: memref<1x64x16xf32, #tpu.memory_space<vmem>>, %arg4: memref<32x32xf32, #tpu.memory_space<vmem>>, %arg5: memref<1x32xf32, #tpu.memory_space<vmem>>, %arg6: memref<32x32xf32, #tpu.memory_space<vmem>>, %arg7: memref<1x32xf32, #tpu.memory_space<vmem>>, %arg8: memref<32x32xf32, #tpu.memory_space<vmem>>, %arg9: memref<1x32xf32, #tpu.memory_space<vmem>>, %arg10: memref<16x8xf32, #tpu.memory_space<vmem>>, %arg11: memref<1x8xf32, #tpu.memory_space<vmem>>, %arg12: memref<16x8xf32, #tpu.memory_space<vmem>>, %arg13: memref<1x8xf32, #tpu.memory_space<vmem>>, %arg14: memref<32x32xf32, #tpu.memory_space<vmem>>, %arg15: memref<1x32xf32, #tpu.memory_space<vmem>>, %arg16: memref<1x16xf32, #tpu.memory_space<vmem>>, %arg17: memref<1x16xf32, #tpu.memory_space<vmem>>, %arg18: memref<1x32xf32, #tpu.memory_space<vmem>>, %arg19: memref<1x32xf32, #tpu.memory_space<vmem>>, %arg20: memref<1x8x32xf32, #tpu.memory_space<vmem>>) attributes {dimension_semantics = [#tpu.dimension_semantics<parallel>], iteration_bounds = array<i64: 2>, scalar_prefetch = 0 : i64, scratch_operands = 0 : i64, tpu.core_type = #tpu.core_type<tc>, window_params = [{transform_indices = @transform_0, window_bounds = array<i64: 1, 8, 32>}, {transform_indices = @transform_1, window_bounds = array<i64: 1, 1, 8>}, {transform_indices = @transform_2, window_bounds = array<i64: 1, 64, 16>}, {pipeline_mode = #tpu.pipeline_mode<synchronous>, transform_indices = @transform_3, window_bounds = array<i64: 32, 32>}, {pipeline_mode = #tpu.pipeline_mode<synchronous>, transform_indices = @transform_4, window_bounds = array<i64: 1, 32>}, {pipeline_mode = #tpu.pipeline_mode<synchronous>, transform_indices = @transform_5, window_bounds = array<i64: 32, 32>}, {pipeline_mode = #tpu.pipeline_mode<synchronous>, transform_indices = @transform_6, window_bounds = array<i64: 1, 32>}, {pipeline_mode = #tpu.pipeline_mode<synchronous>, transform_indices = @transform_7, window_bounds = array<i64: 32, 32>}, {pipeline_mode = #tpu.pipeline_mode<synchronous>, transform_indices = @transform_8, window_bounds = array<i64: 1, 32>}, {pipeline_mode = #tpu.pipeline_mode<synchronous>, transform_indices = @transform_9, window_bounds = array<i64: 16, 8>}, {pipeline_mode = #tpu.pipeline_mode<synchronous>, transform_indices = @transform_10, window_bounds = array<i64: 1, 8>}, {pipeline_mode = #tpu.pipeline_mode<synchronous>, transform_indices = @transform_11, window_bounds = array<i64: 16, 8>}, {pipeline_mode = #tpu.pipeline_mode<synchronous>, transform_indices = @transform_12, window_bounds = array<i64: 1, 8>}, {pipeline_mode = #tpu.pipeline_mode<synchronous>, transform_indices = @transform_13, window_bounds = array<i64: 32, 32>}, {pipeline_mode = #tpu.pipeline_mode<synchronous>, transform_indices = @transform_14, window_bounds = array<i64: 1, 32>}, {pipeline_mode = #tpu.pipeline_mode<synchronous>, transform_indices = @transform_15, window_bounds = array<i64: 1, 16>}, {pipeline_mode = #tpu.pipeline_mode<synchronous>, transform_indices = @transform_16, window_bounds = array<i64: 1, 16>}, {pipeline_mode = #tpu.pipeline_mode<synchronous>, transform_indices = @transform_17, window_bounds = array<i64: 1, 32>}, {pipeline_mode = #tpu.pipeline_mode<synchronous>, transform_indices = @transform_18, window_bounds = array<i64: 1, 32>}, {transform_indices = @transform_19, window_bounds = array<i64: 1, 8, 32>}]} {
    %c0 = arith.constant 0 : index
    %c0_0 = arith.constant 0 : index
    %c0_1 = arith.constant 0 : index
    %0 = vector.load %arg1[%c0, %c0_0, %c0_1] : memref<1x8x32xf32, #tpu.memory_space<vmem>>, vector<1x8x32xf32>
    %1 = vector.shape_cast %0 : vector<1x8x32xf32> to vector<8x32xf32>
    %c0_2 = arith.constant 0 : index
    %c0_3 = arith.constant 0 : index
    %2 = vector.load %arg4[%c0_2, %c0_3] : memref<32x32xf32, #tpu.memory_space<vmem>>, vector<32x32xf32>
    %cst = arith.constant dense<0.000000e+00> : vector<8x32xf32>
    %3 = tpu.matmul %1, %2, %cst {dimension_numbers = #tpu.dot_dimension_numbers<[1], [0], [0], [1], [0, 0, 1, 1], [], []>} : vector<8x32xf32>, vector<32x32xf32>, vector<8x32xf32> -> vector<8x32xf32>
    %c0_4 = arith.constant 0 : index
    %c0_5 = arith.constant 0 : index
    %4 = vector.load %arg5[%c0_4, %c0_5] : memref<1x32xf32, #tpu.memory_space<vmem>>, vector<1x32xf32>
    %5 = vector.broadcast %4 : vector<1x32xf32> to vector<8x32xf32>
    %6 = arith.addf %3, %5 : vector<8x32xf32>
    %c0_6 = arith.constant 0 : index
    %c0_7 = arith.constant 0 : index
    %7 = vector.load %arg6[%c0_6, %c0_7] : memref<32x32xf32, #tpu.memory_space<vmem>>, vector<32x32xf32>
    %cst_8 = arith.constant dense<0.000000e+00> : vector<8x32xf32>
    %8 = tpu.matmul %1, %7, %cst_8 {dimension_numbers = #tpu.dot_dimension_numbers<[1], [0], [0], [1], [0, 0, 1, 1], [], []>} : vector<8x32xf32>, vector<32x32xf32>, vector<8x32xf32> -> vector<8x32xf32>
    %c0_9 = arith.constant 0 : index
    %c0_10 = arith.constant 0 : index
    %9 = vector.load %arg7[%c0_9, %c0_10] : memref<1x32xf32, #tpu.memory_space<vmem>>, vector<1x32xf32>
    %10 = vector.broadcast %9 : vector<1x32xf32> to vector<8x32xf32>
    %11 = arith.addf %8, %10 : vector<8x32xf32>
    %c0_11 = arith.constant 0 : index
    %c0_12 = arith.constant 0 : index
    %12 = vector.load %arg8[%c0_11, %c0_12] : memref<32x32xf32, #tpu.memory_space<vmem>>, vector<32x32xf32>
    %cst_13 = arith.constant dense<0.000000e+00> : vector<8x32xf32>
    %13 = tpu.matmul %1, %12, %cst_13 {dimension_numbers = #tpu.dot_dimension_numbers<[1], [0], [0], [1], [0, 0, 1, 1], [], []>} : vector<8x32xf32>, vector<32x32xf32>, vector<8x32xf32> -> vector<8x32xf32>
    %c0_14 = arith.constant 0 : index
    %c0_15 = arith.constant 0 : index
    %14 = vector.load %arg9[%c0_14, %c0_15] : memref<1x32xf32, #tpu.memory_space<vmem>>, vector<1x32xf32>
    %15 = vector.broadcast %14 : vector<1x32xf32> to vector<8x32xf32>
    %16 = arith.addf %13, %15 : vector<8x32xf32>
    %cst_16 = arith.constant 0.353553385 : f32
    %17 = vector.broadcast %cst_16 : f32 to vector<8x32xf32>
    %18 = arith.mulf %6, %17 : vector<8x32xf32>
    %c0_17 = arith.constant 0 : index
    %c0_18 = arith.constant 0 : index
    %c0_19 = arith.constant 0 : index
    %19 = vector.load %arg3[%c0_17, %c0_18, %c0_19] : memref<1x64x16xf32, #tpu.memory_space<vmem>>, vector<1x64x16xf32>
    %20 = vector.shape_cast %19 : vector<1x64x16xf32> to vector<64x16xf32>
    %cst_20 = arith.constant dense<0.000000e+00> : vector<64xf32>
    %21 = vector.multi_reduction <add>, %20, %cst_20 [1] : vector<64x16xf32> to vector<64xf32>
    %22 = vector.shape_cast %21 : vector<64xf32> to vector<64x1xf32>
    %cst_21 = arith.constant 1.600000e+01 : f32
    %23 = vector.broadcast %cst_21 : f32 to vector<64x1xf32>
    %24 = arith.divf %22, %23 : vector<64x1xf32>
    %25 = vector.broadcast %24 : vector<64x1xf32> to vector<64x16xf32>
    %26 = arith.subf %20, %25 : vector<64x16xf32>
    %27 = arith.mulf %26, %26 : vector<64x16xf32>
    %cst_22 = arith.constant dense<0.000000e+00> : vector<64xf32>
    %28 = vector.multi_reduction <add>, %27, %cst_22 [1] : vector<64x16xf32> to vector<64xf32>
    %29 = vector.shape_cast %28 : vector<64xf32> to vector<64x1xf32>
    %cst_23 = arith.constant 1.600000e+01 : f32
    %30 = vector.broadcast %cst_23 : f32 to vector<64x1xf32>
    %31 = arith.divf %29, %30 : vector<64x1xf32>
    %cst_24 = arith.constant 9.99999974E-6 : f32
    %32 = vector.broadcast %cst_24 : f32 to vector<64x1xf32>
    %33 = arith.addf %31, %32 : vector<64x1xf32>
    %34 = math.rsqrt %33 : vector<64x1xf32>
    %35 = vector.broadcast %34 : vector<64x1xf32> to vector<64x16xf32>
    %36 = arith.mulf %26, %35 : vector<64x16xf32>
    %c0_25 = arith.constant 0 : index
    %c0_26 = arith.constant 0 : index
    %37 = vector.load %arg16[%c0_25, %c0_26] : memref<1x16xf32, #tpu.memory_space<vmem>>, vector<1x16xf32>
    %38 = vector.broadcast %37 : vector<1x16xf32> to vector<64x16xf32>
    %39 = arith.mulf %36, %38 : vector<64x16xf32>
    %c0_27 = arith.constant 0 : index
    %c0_28 = arith.constant 0 : index
    %40 = vector.load %arg17[%c0_27, %c0_28] : memref<1x16xf32, #tpu.memory_space<vmem>>, vector<1x16xf32>
    %41 = vector.broadcast %40 : vector<1x16xf32> to vector<64x16xf32>
    %42 = arith.addf %39, %41 : vector<64x16xf32>
    %c0_29 = arith.constant 0 : index
    %c0_30 = arith.constant 0 : index
    %43 = vector.load %arg10[%c0_29, %c0_30] : memref<16x8xf32, #tpu.memory_space<vmem>>, vector<16x8xf32>
    %cst_31 = arith.constant dense<0.000000e+00> : vector<64x8xf32>
    %44 = tpu.matmul %42, %43, %cst_31 {dimension_numbers = #tpu.dot_dimension_numbers<[1], [0], [0], [1], [0, 0, 1, 1], [], []>} : vector<64x16xf32>, vector<16x8xf32>, vector<64x8xf32> -> vector<64x8xf32>
    %c0_32 = arith.constant 0 : index
    %c0_33 = arith.constant 0 : index
    %45 = vector.load %arg11[%c0_32, %c0_33] : memref<1x8xf32, #tpu.memory_space<vmem>>, vector<1x8xf32>
    %46 = vector.broadcast %45 : vector<1x8xf32> to vector<64x8xf32>
    %47 = arith.addf %44, %46 : vector<64x8xf32>
    %c0_34 = arith.constant 0 : index
    %c0_35 = arith.constant 0 : index
    %48 = vector.load %arg12[%c0_34, %c0_35] : memref<16x8xf32, #tpu.memory_space<vmem>>, vector<16x8xf32>
    %cst_36 = arith.constant dense<0.000000e+00> : vector<64x8xf32>
    %49 = tpu.matmul %42, %48, %cst_36 {dimension_numbers = #tpu.dot_dimension_numbers<[1], [0], [0], [1], [0, 0, 1, 1], [], []>} : vector<64x16xf32>, vector<16x8xf32>, vector<64x8xf32> -> vector<64x8xf32>
    %c0_37 = arith.constant 0 : index
    %c0_38 = arith.constant 0 : index
    %50 = vector.load %arg13[%c0_37, %c0_38] : memref<1x8xf32, #tpu.memory_space<vmem>>, vector<1x8xf32>
    %51 = vector.broadcast %50 : vector<1x8xf32> to vector<64x8xf32>
    %52 = arith.addf %49, %51 : vector<64x8xf32>
    %c0_39 = arith.constant 0 : index
    %c0_40 = arith.constant 0 : index
    %c0_41 = arith.constant 0 : index
    %53 = vector.load %arg2[%c0_39, %c0_40, %c0_41] : memref<1x1x8xf32, #tpu.memory_space<vmem>>, vector<1x1x8xf32>
    %54 = vector.shape_cast %53 : vector<1x1x8xf32> to vector<1x8xf32>
    %55 = vector.extract_strided_slice %18 {offsets = [0, 0], sizes = [8, 8], strides = [1, 1]} : vector<8x32xf32> to vector<8x8xf32>
    %56 = vector.extract_strided_slice %11 {offsets = [0, 0], sizes = [8, 8], strides = [1, 1]} : vector<8x32xf32> to vector<8x8xf32>
    %57 = vector.extract_strided_slice %16 {offsets = [0, 0], sizes = [8, 8], strides = [1, 1]} : vector<8x32xf32> to vector<8x8xf32>
    %cst_42 = arith.constant dense<0.000000e+00> : vector<8x8xf32>
    %58 = tpu.matmul %55, %56, %cst_42 {dimension_numbers = #tpu.dot_dimension_numbers<[1], [1], [0], [0], [0, 0, 1, 0], [], []>} : vector<8x8xf32>, vector<8x8xf32>, vector<8x8xf32> -> vector<8x8xf32>
    %59 = vector.extract_strided_slice %47 {offsets = [0, 0], sizes = [8, 8], strides = [1, 1]} : vector<64x8xf32> to vector<8x8xf32>
    %60 = arith.mulf %55, %59 : vector<8x8xf32>
    %cst_43 = arith.constant dense<0.000000e+00> : vector<8xf32>
    %61 = vector.multi_reduction <add>, %60, %cst_43 [1] : vector<8x8xf32> to vector<8xf32>
    %62 = vector.shape_cast %61 : vector<8xf32> to vector<8x1xf32>
    %63 = vector.extract_strided_slice %47 {offsets = [8, 0], sizes = [8, 8], strides = [1, 1]} : vector<64x8xf32> to vector<8x8xf32>
    %64 = arith.mulf %55, %63 : vector<8x8xf32>
    %cst_44 = arith.constant dense<0.000000e+00> : vector<8xf32>
    %65 = vector.multi_reduction <add>, %64, %cst_44 [1] : vector<8x8xf32> to vector<8xf32>
    %66 = vector.shape_cast %65 : vector<8xf32> to vector<8x1xf32>
    %67 = vector.extract_strided_slice %47 {offsets = [16, 0], sizes = [8, 8], strides = [1, 1]} : vector<64x8xf32> to vector<8x8xf32>
    %68 = arith.mulf %55, %67 : vector<8x8xf32>
    %cst_45 = arith.constant dense<0.000000e+00> : vector<8xf32>
    %69 = vector.multi_reduction <add>, %68, %cst_45 [1] : vector<8x8xf32> to vector<8xf32>
    %70 = vector.shape_cast %69 : vector<8xf32> to vector<8x1xf32>
    %71 = vector.extract_strided_slice %47 {offsets = [24, 0], sizes = [8, 8], strides = [1, 1]} : vector<64x8xf32> to vector<8x8xf32>
    %72 = arith.mulf %55, %71 : vector<8x8xf32>
    %cst_46 = arith.constant dense<0.000000e+00> : vector<8xf32>
    %73 = vector.multi_reduction <add>, %72, %cst_46 [1] : vector<8x8xf32> to vector<8xf32>
    %74 = vector.shape_cast %73 : vector<8xf32> to vector<8x1xf32>
    %75 = vector.extract_strided_slice %47 {offsets = [32, 0], sizes = [8, 8], strides = [1, 1]} : vector<64x8xf32> to vector<8x8xf32>
    %76 = arith.mulf %55, %75 : vector<8x8xf32>
    %cst_47 = arith.constant dense<0.000000e+00> : vector<8xf32>
    %77 = vector.multi_reduction <add>, %76, %cst_47 [1] : vector<8x8xf32> to vector<8xf32>
    %78 = vector.shape_cast %77 : vector<8xf32> to vector<8x1xf32>
    %79 = vector.extract_strided_slice %47 {offsets = [40, 0], sizes = [8, 8], strides = [1, 1]} : vector<64x8xf32> to vector<8x8xf32>
    %80 = arith.mulf %55, %79 : vector<8x8xf32>
    %cst_48 = arith.constant dense<0.000000e+00> : vector<8xf32>
    %81 = vector.multi_reduction <add>, %80, %cst_48 [1] : vector<8x8xf32> to vector<8xf32>
    %82 = vector.shape_cast %81 : vector<8xf32> to vector<8x1xf32>
    %83 = vector.extract_strided_slice %47 {offsets = [48, 0], sizes = [8, 8], strides = [1, 1]} : vector<64x8xf32> to vector<8x8xf32>
    %84 = arith.mulf %55, %83 : vector<8x8xf32>
    %cst_49 = arith.constant dense<0.000000e+00> : vector<8xf32>
    %85 = vector.multi_reduction <add>, %84, %cst_49 [1] : vector<8x8xf32> to vector<8xf32>
    %86 = vector.shape_cast %85 : vector<8xf32> to vector<8x1xf32>
    %87 = vector.extract_strided_slice %47 {offsets = [56, 0], sizes = [8, 8], strides = [1, 1]} : vector<64x8xf32> to vector<8x8xf32>
    %88 = arith.mulf %55, %87 : vector<8x8xf32>
    %cst_50 = arith.constant dense<0.000000e+00> : vector<8xf32>
    %89 = vector.multi_reduction <add>, %88, %cst_50 [1] : vector<8x8xf32> to vector<8xf32>
    %90 = vector.shape_cast %89 : vector<8xf32> to vector<8x1xf32>
    %91 = tpu.concatenate %62, %66, %70, %74, %78, %82, %86, %90 in 1 : vector<8x1xf32>, vector<8x1xf32>, vector<8x1xf32>, vector<8x1xf32>, vector<8x1xf32>, vector<8x1xf32>, vector<8x1xf32>, vector<8x1xf32> -> vector<8x8xf32>
    %92 = arith.addf %58, %91 : vector<8x8xf32>
    %93 = vector.broadcast %54 : vector<1x8xf32> to vector<8x8xf32>
    %94 = arith.addf %92, %93 : vector<8x8xf32>
    %cst_51 = arith.constant dense<0xFF800000> : vector<8xf32>
    %95 = vector.multi_reduction <maximumf>, %94, %cst_51 [1] : vector<8x8xf32> to vector<8xf32>
    %96 = vector.shape_cast %95 : vector<8xf32> to vector<8x1xf32>
    %97 = vector.broadcast %96 : vector<8x1xf32> to vector<8x8xf32>
    %98 = arith.subf %94, %97 : vector<8x8xf32>
    %99 = math.exp %98 : vector<8x8xf32>
    %cst_52 = arith.constant dense<0.000000e+00> : vector<8xf32>
    %100 = vector.multi_reduction <add>, %99, %cst_52 [1] : vector<8x8xf32> to vector<8xf32>
    %101 = vector.shape_cast %100 : vector<8xf32> to vector<8x1xf32>
    %102 = vector.broadcast %101 : vector<8x1xf32> to vector<8x8xf32>
    %103 = arith.divf %99, %102 : vector<8x8xf32>
    %cst_53 = arith.constant dense<0.000000e+00> : vector<8x8xf32>
    %104 = tpu.matmul %103, %57, %cst_53 {dimension_numbers = #tpu.dot_dimension_numbers<[1], [0], [0], [1], [0, 0, 1, 1], [], []>} : vector<8x8xf32>, vector<8x8xf32>, vector<8x8xf32> -> vector<8x8xf32>
    %105 = vector.extract_strided_slice %52 {offsets = [0, 0], sizes = [8, 8], strides = [1, 1]} : vector<64x8xf32> to vector<8x8xf32>
    %106 = vector.extract_strided_slice %103 {offsets = [0, 0], sizes = [8, 1], strides = [1, 1]} : vector<8x8xf32> to vector<8x1xf32>
    %107 = vector.broadcast %106 : vector<8x1xf32> to vector<8x8xf32>
    %108 = arith.mulf %107, %105 : vector<8x8xf32>
    %109 = arith.addf %104, %108 : vector<8x8xf32>
    %110 = vector.extract_strided_slice %52 {offsets = [8, 0], sizes = [8, 8], strides = [1, 1]} : vector<64x8xf32> to vector<8x8xf32>
    %111 = vector.extract_strided_slice %103 {offsets = [0, 1], sizes = [8, 1], strides = [1, 1]} : vector<8x8xf32> to vector<8x1xf32>
    %112 = vector.broadcast %111 : vector<8x1xf32> to vector<8x8xf32>
    %113 = arith.mulf %112, %110 : vector<8x8xf32>
    %114 = arith.addf %109, %113 : vector<8x8xf32>
    %115 = vector.extract_strided_slice %52 {offsets = [16, 0], sizes = [8, 8], strides = [1, 1]} : vector<64x8xf32> to vector<8x8xf32>
    %116 = vector.extract_strided_slice %103 {offsets = [0, 2], sizes = [8, 1], strides = [1, 1]} : vector<8x8xf32> to vector<8x1xf32>
    %117 = vector.broadcast %116 : vector<8x1xf32> to vector<8x8xf32>
    %118 = arith.mulf %117, %115 : vector<8x8xf32>
    %119 = arith.addf %114, %118 : vector<8x8xf32>
    %120 = vector.extract_strided_slice %52 {offsets = [24, 0], sizes = [8, 8], strides = [1, 1]} : vector<64x8xf32> to vector<8x8xf32>
    %121 = vector.extract_strided_slice %103 {offsets = [0, 3], sizes = [8, 1], strides = [1, 1]} : vector<8x8xf32> to vector<8x1xf32>
    %122 = vector.broadcast %121 : vector<8x1xf32> to vector<8x8xf32>
    %123 = arith.mulf %122, %120 : vector<8x8xf32>
    %124 = arith.addf %119, %123 : vector<8x8xf32>
    %125 = vector.extract_strided_slice %52 {offsets = [32, 0], sizes = [8, 8], strides = [1, 1]} : vector<64x8xf32> to vector<8x8xf32>
    %126 = vector.extract_strided_slice %103 {offsets = [0, 4], sizes = [8, 1], strides = [1, 1]} : vector<8x8xf32> to vector<8x1xf32>
    %127 = vector.broadcast %126 : vector<8x1xf32> to vector<8x8xf32>
    %128 = arith.mulf %127, %125 : vector<8x8xf32>
    %129 = arith.addf %124, %128 : vector<8x8xf32>
    %130 = vector.extract_strided_slice %52 {offsets = [40, 0], sizes = [8, 8], strides = [1, 1]} : vector<64x8xf32> to vector<8x8xf32>
    %131 = vector.extract_strided_slice %103 {offsets = [0, 5], sizes = [8, 1], strides = [1, 1]} : vector<8x8xf32> to vector<8x1xf32>
    %132 = vector.broadcast %131 : vector<8x1xf32> to vector<8x8xf32>
    %133 = arith.mulf %132, %130 : vector<8x8xf32>
    %134 = arith.addf %129, %133 : vector<8x8xf32>
    %135 = vector.extract_strided_slice %52 {offsets = [48, 0], sizes = [8, 8], strides = [1, 1]} : vector<64x8xf32> to vector<8x8xf32>
    %136 = vector.extract_strided_slice %103 {offsets = [0, 6], sizes = [8, 1], strides = [1, 1]} : vector<8x8xf32> to vector<8x1xf32>
    %137 = vector.broadcast %136 : vector<8x1xf32> to vector<8x8xf32>
    %138 = arith.mulf %137, %135 : vector<8x8xf32>
    %139 = arith.addf %134, %138 : vector<8x8xf32>
    %140 = vector.extract_strided_slice %52 {offsets = [56, 0], sizes = [8, 8], strides = [1, 1]} : vector<64x8xf32> to vector<8x8xf32>
    %141 = vector.extract_strided_slice %103 {offsets = [0, 7], sizes = [8, 1], strides = [1, 1]} : vector<8x8xf32> to vector<8x1xf32>
    %142 = vector.broadcast %141 : vector<8x1xf32> to vector<8x8xf32>
    %143 = arith.mulf %142, %140 : vector<8x8xf32>
    %144 = arith.addf %139, %143 : vector<8x8xf32>
    %145 = vector.extract_strided_slice %18 {offsets = [0, 8], sizes = [8, 8], strides = [1, 1]} : vector<8x32xf32> to vector<8x8xf32>
    %146 = vector.extract_strided_slice %11 {offsets = [0, 8], sizes = [8, 8], strides = [1, 1]} : vector<8x32xf32> to vector<8x8xf32>
    %147 = vector.extract_strided_slice %16 {offsets = [0, 8], sizes = [8, 8], strides = [1, 1]} : vector<8x32xf32> to vector<8x8xf32>
    %cst_54 = arith.constant dense<0.000000e+00> : vector<8x8xf32>
    %148 = tpu.matmul %145, %146, %cst_54 {dimension_numbers = #tpu.dot_dimension_numbers<[1], [1], [0], [0], [0, 0, 1, 0], [], []>} : vector<8x8xf32>, vector<8x8xf32>, vector<8x8xf32> -> vector<8x8xf32>
    %149 = vector.extract_strided_slice %47 {offsets = [0, 0], sizes = [8, 8], strides = [1, 1]} : vector<64x8xf32> to vector<8x8xf32>
    %150 = arith.mulf %145, %149 : vector<8x8xf32>
    %cst_55 = arith.constant dense<0.000000e+00> : vector<8xf32>
    %151 = vector.multi_reduction <add>, %150, %cst_55 [1] : vector<8x8xf32> to vector<8xf32>
    %152 = vector.shape_cast %151 : vector<8xf32> to vector<8x1xf32>
    %153 = vector.extract_strided_slice %47 {offsets = [8, 0], sizes = [8, 8], strides = [1, 1]} : vector<64x8xf32> to vector<8x8xf32>
    %154 = arith.mulf %145, %153 : vector<8x8xf32>
    %cst_56 = arith.constant dense<0.000000e+00> : vector<8xf32>
    %155 = vector.multi_reduction <add>, %154, %cst_56 [1] : vector<8x8xf32> to vector<8xf32>
    %156 = vector.shape_cast %155 : vector<8xf32> to vector<8x1xf32>
    %157 = vector.extract_strided_slice %47 {offsets = [16, 0], sizes = [8, 8], strides = [1, 1]} : vector<64x8xf32> to vector<8x8xf32>
    %158 = arith.mulf %145, %157 : vector<8x8xf32>
    %cst_57 = arith.constant dense<0.000000e+00> : vector<8xf32>
    %159 = vector.multi_reduction <add>, %158, %cst_57 [1] : vector<8x8xf32> to vector<8xf32>
    %160 = vector.shape_cast %159 : vector<8xf32> to vector<8x1xf32>
    %161 = vector.extract_strided_slice %47 {offsets = [24, 0], sizes = [8, 8], strides = [1, 1]} : vector<64x8xf32> to vector<8x8xf32>
    %162 = arith.mulf %145, %161 : vector<8x8xf32>
    %cst_58 = arith.constant dense<0.000000e+00> : vector<8xf32>
    %163 = vector.multi_reduction <add>, %162, %cst_58 [1] : vector<8x8xf32> to vector<8xf32>
    %164 = vector.shape_cast %163 : vector<8xf32> to vector<8x1xf32>
    %165 = vector.extract_strided_slice %47 {offsets = [32, 0], sizes = [8, 8], strides = [1, 1]} : vector<64x8xf32> to vector<8x8xf32>
    %166 = arith.mulf %145, %165 : vector<8x8xf32>
    %cst_59 = arith.constant dense<0.000000e+00> : vector<8xf32>
    %167 = vector.multi_reduction <add>, %166, %cst_59 [1] : vector<8x8xf32> to vector<8xf32>
    %168 = vector.shape_cast %167 : vector<8xf32> to vector<8x1xf32>
    %169 = vector.extract_strided_slice %47 {offsets = [40, 0], sizes = [8, 8], strides = [1, 1]} : vector<64x8xf32> to vector<8x8xf32>
    %170 = arith.mulf %145, %169 : vector<8x8xf32>
    %cst_60 = arith.constant dense<0.000000e+00> : vector<8xf32>
    %171 = vector.multi_reduction <add>, %170, %cst_60 [1] : vector<8x8xf32> to vector<8xf32>
    %172 = vector.shape_cast %171 : vector<8xf32> to vector<8x1xf32>
    %173 = vector.extract_strided_slice %47 {offsets = [48, 0], sizes = [8, 8], strides = [1, 1]} : vector<64x8xf32> to vector<8x8xf32>
    %174 = arith.mulf %145, %173 : vector<8x8xf32>
    %cst_61 = arith.constant dense<0.000000e+00> : vector<8xf32>
    %175 = vector.multi_reduction <add>, %174, %cst_61 [1] : vector<8x8xf32> to vector<8xf32>
    %176 = vector.shape_cast %175 : vector<8xf32> to vector<8x1xf32>
    %177 = vector.extract_strided_slice %47 {offsets = [56, 0], sizes = [8, 8], strides = [1, 1]} : vector<64x8xf32> to vector<8x8xf32>
    %178 = arith.mulf %145, %177 : vector<8x8xf32>
    %cst_62 = arith.constant dense<0.000000e+00> : vector<8xf32>
    %179 = vector.multi_reduction <add>, %178, %cst_62 [1] : vector<8x8xf32> to vector<8xf32>
    %180 = vector.shape_cast %179 : vector<8xf32> to vector<8x1xf32>
    %181 = tpu.concatenate %152, %156, %160, %164, %168, %172, %176, %180 in 1 : vector<8x1xf32>, vector<8x1xf32>, vector<8x1xf32>, vector<8x1xf32>, vector<8x1xf32>, vector<8x1xf32>, vector<8x1xf32>, vector<8x1xf32> -> vector<8x8xf32>
    %182 = arith.addf %148, %181 : vector<8x8xf32>
    %183 = vector.broadcast %54 : vector<1x8xf32> to vector<8x8xf32>
    %184 = arith.addf %182, %183 : vector<8x8xf32>
    %cst_63 = arith.constant dense<0xFF800000> : vector<8xf32>
    %185 = vector.multi_reduction <maximumf>, %184, %cst_63 [1] : vector<8x8xf32> to vector<8xf32>
    %186 = vector.shape_cast %185 : vector<8xf32> to vector<8x1xf32>
    %187 = vector.broadcast %186 : vector<8x1xf32> to vector<8x8xf32>
    %188 = arith.subf %184, %187 : vector<8x8xf32>
    %189 = math.exp %188 : vector<8x8xf32>
    %cst_64 = arith.constant dense<0.000000e+00> : vector<8xf32>
    %190 = vector.multi_reduction <add>, %189, %cst_64 [1] : vector<8x8xf32> to vector<8xf32>
    %191 = vector.shape_cast %190 : vector<8xf32> to vector<8x1xf32>
    %192 = vector.broadcast %191 : vector<8x1xf32> to vector<8x8xf32>
    %193 = arith.divf %189, %192 : vector<8x8xf32>
    %cst_65 = arith.constant dense<0.000000e+00> : vector<8x8xf32>
    %194 = tpu.matmul %193, %147, %cst_65 {dimension_numbers = #tpu.dot_dimension_numbers<[1], [0], [0], [1], [0, 0, 1, 1], [], []>} : vector<8x8xf32>, vector<8x8xf32>, vector<8x8xf32> -> vector<8x8xf32>
    %195 = vector.extract_strided_slice %52 {offsets = [0, 0], sizes = [8, 8], strides = [1, 1]} : vector<64x8xf32> to vector<8x8xf32>
    %196 = vector.extract_strided_slice %193 {offsets = [0, 0], sizes = [8, 1], strides = [1, 1]} : vector<8x8xf32> to vector<8x1xf32>
    %197 = vector.broadcast %196 : vector<8x1xf32> to vector<8x8xf32>
    %198 = arith.mulf %197, %195 : vector<8x8xf32>
    %199 = arith.addf %194, %198 : vector<8x8xf32>
    %200 = vector.extract_strided_slice %52 {offsets = [8, 0], sizes = [8, 8], strides = [1, 1]} : vector<64x8xf32> to vector<8x8xf32>
    %201 = vector.extract_strided_slice %193 {offsets = [0, 1], sizes = [8, 1], strides = [1, 1]} : vector<8x8xf32> to vector<8x1xf32>
    %202 = vector.broadcast %201 : vector<8x1xf32> to vector<8x8xf32>
    %203 = arith.mulf %202, %200 : vector<8x8xf32>
    %204 = arith.addf %199, %203 : vector<8x8xf32>
    %205 = vector.extract_strided_slice %52 {offsets = [16, 0], sizes = [8, 8], strides = [1, 1]} : vector<64x8xf32> to vector<8x8xf32>
    %206 = vector.extract_strided_slice %193 {offsets = [0, 2], sizes = [8, 1], strides = [1, 1]} : vector<8x8xf32> to vector<8x1xf32>
    %207 = vector.broadcast %206 : vector<8x1xf32> to vector<8x8xf32>
    %208 = arith.mulf %207, %205 : vector<8x8xf32>
    %209 = arith.addf %204, %208 : vector<8x8xf32>
    %210 = vector.extract_strided_slice %52 {offsets = [24, 0], sizes = [8, 8], strides = [1, 1]} : vector<64x8xf32> to vector<8x8xf32>
    %211 = vector.extract_strided_slice %193 {offsets = [0, 3], sizes = [8, 1], strides = [1, 1]} : vector<8x8xf32> to vector<8x1xf32>
    %212 = vector.broadcast %211 : vector<8x1xf32> to vector<8x8xf32>
    %213 = arith.mulf %212, %210 : vector<8x8xf32>
    %214 = arith.addf %209, %213 : vector<8x8xf32>
    %215 = vector.extract_strided_slice %52 {offsets = [32, 0], sizes = [8, 8], strides = [1, 1]} : vector<64x8xf32> to vector<8x8xf32>
    %216 = vector.extract_strided_slice %193 {offsets = [0, 4], sizes = [8, 1], strides = [1, 1]} : vector<8x8xf32> to vector<8x1xf32>
    %217 = vector.broadcast %216 : vector<8x1xf32> to vector<8x8xf32>
    %218 = arith.mulf %217, %215 : vector<8x8xf32>
    %219 = arith.addf %214, %218 : vector<8x8xf32>
    %220 = vector.extract_strided_slice %52 {offsets = [40, 0], sizes = [8, 8], strides = [1, 1]} : vector<64x8xf32> to vector<8x8xf32>
    %221 = vector.extract_strided_slice %193 {offsets = [0, 5], sizes = [8, 1], strides = [1, 1]} : vector<8x8xf32> to vector<8x1xf32>
    %222 = vector.broadcast %221 : vector<8x1xf32> to vector<8x8xf32>
    %223 = arith.mulf %222, %220 : vector<8x8xf32>
    %224 = arith.addf %219, %223 : vector<8x8xf32>
    %225 = vector.extract_strided_slice %52 {offsets = [48, 0], sizes = [8, 8], strides = [1, 1]} : vector<64x8xf32> to vector<8x8xf32>
    %226 = vector.extract_strided_slice %193 {offsets = [0, 6], sizes = [8, 1], strides = [1, 1]} : vector<8x8xf32> to vector<8x1xf32>
    %227 = vector.broadcast %226 : vector<8x1xf32> to vector<8x8xf32>
    %228 = arith.mulf %227, %225 : vector<8x8xf32>
    %229 = arith.addf %224, %228 : vector<8x8xf32>
    %230 = vector.extract_strided_slice %52 {offsets = [56, 0], sizes = [8, 8], strides = [1, 1]} : vector<64x8xf32> to vector<8x8xf32>
    %231 = vector.extract_strided_slice %193 {offsets = [0, 7], sizes = [8, 1], strides = [1, 1]} : vector<8x8xf32> to vector<8x1xf32>
    %232 = vector.broadcast %231 : vector<8x1xf32> to vector<8x8xf32>
    %233 = arith.mulf %232, %230 : vector<8x8xf32>
    %234 = arith.addf %229, %233 : vector<8x8xf32>
    %235 = vector.extract_strided_slice %18 {offsets = [0, 16], sizes = [8, 8], strides = [1, 1]} : vector<8x32xf32> to vector<8x8xf32>
    %236 = vector.extract_strided_slice %11 {offsets = [0, 16], sizes = [8, 8], strides = [1, 1]} : vector<8x32xf32> to vector<8x8xf32>
    %237 = vector.extract_strided_slice %16 {offsets = [0, 16], sizes = [8, 8], strides = [1, 1]} : vector<8x32xf32> to vector<8x8xf32>
    %cst_66 = arith.constant dense<0.000000e+00> : vector<8x8xf32>
    %238 = tpu.matmul %235, %236, %cst_66 {dimension_numbers = #tpu.dot_dimension_numbers<[1], [1], [0], [0], [0, 0, 1, 0], [], []>} : vector<8x8xf32>, vector<8x8xf32>, vector<8x8xf32> -> vector<8x8xf32>
    %239 = vector.extract_strided_slice %47 {offsets = [0, 0], sizes = [8, 8], strides = [1, 1]} : vector<64x8xf32> to vector<8x8xf32>
    %240 = arith.mulf %235, %239 : vector<8x8xf32>
    %cst_67 = arith.constant dense<0.000000e+00> : vector<8xf32>
    %241 = vector.multi_reduction <add>, %240, %cst_67 [1] : vector<8x8xf32> to vector<8xf32>
    %242 = vector.shape_cast %241 : vector<8xf32> to vector<8x1xf32>
    %243 = vector.extract_strided_slice %47 {offsets = [8, 0], sizes = [8, 8], strides = [1, 1]} : vector<64x8xf32> to vector<8x8xf32>
    %244 = arith.mulf %235, %243 : vector<8x8xf32>
    %cst_68 = arith.constant dense<0.000000e+00> : vector<8xf32>
    %245 = vector.multi_reduction <add>, %244, %cst_68 [1] : vector<8x8xf32> to vector<8xf32>
    %246 = vector.shape_cast %245 : vector<8xf32> to vector<8x1xf32>
    %247 = vector.extract_strided_slice %47 {offsets = [16, 0], sizes = [8, 8], strides = [1, 1]} : vector<64x8xf32> to vector<8x8xf32>
    %248 = arith.mulf %235, %247 : vector<8x8xf32>
    %cst_69 = arith.constant dense<0.000000e+00> : vector<8xf32>
    %249 = vector.multi_reduction <add>, %248, %cst_69 [1] : vector<8x8xf32> to vector<8xf32>
    %250 = vector.shape_cast %249 : vector<8xf32> to vector<8x1xf32>
    %251 = vector.extract_strided_slice %47 {offsets = [24, 0], sizes = [8, 8], strides = [1, 1]} : vector<64x8xf32> to vector<8x8xf32>
    %252 = arith.mulf %235, %251 : vector<8x8xf32>
    %cst_70 = arith.constant dense<0.000000e+00> : vector<8xf32>
    %253 = vector.multi_reduction <add>, %252, %cst_70 [1] : vector<8x8xf32> to vector<8xf32>
    %254 = vector.shape_cast %253 : vector<8xf32> to vector<8x1xf32>
    %255 = vector.extract_strided_slice %47 {offsets = [32, 0], sizes = [8, 8], strides = [1, 1]} : vector<64x8xf32> to vector<8x8xf32>
    %256 = arith.mulf %235, %255 : vector<8x8xf32>
    %cst_71 = arith.constant dense<0.000000e+00> : vector<8xf32>
    %257 = vector.multi_reduction <add>, %256, %cst_71 [1] : vector<8x8xf32> to vector<8xf32>
    %258 = vector.shape_cast %257 : vector<8xf32> to vector<8x1xf32>
    %259 = vector.extract_strided_slice %47 {offsets = [40, 0], sizes = [8, 8], strides = [1, 1]} : vector<64x8xf32> to vector<8x8xf32>
    %260 = arith.mulf %235, %259 : vector<8x8xf32>
    %cst_72 = arith.constant dense<0.000000e+00> : vector<8xf32>
    %261 = vector.multi_reduction <add>, %260, %cst_72 [1] : vector<8x8xf32> to vector<8xf32>
    %262 = vector.shape_cast %261 : vector<8xf32> to vector<8x1xf32>
    %263 = vector.extract_strided_slice %47 {offsets = [48, 0], sizes = [8, 8], strides = [1, 1]} : vector<64x8xf32> to vector<8x8xf32>
    %264 = arith.mulf %235, %263 : vector<8x8xf32>
    %cst_73 = arith.constant dense<0.000000e+00> : vector<8xf32>
    %265 = vector.multi_reduction <add>, %264, %cst_73 [1] : vector<8x8xf32> to vector<8xf32>
    %266 = vector.shape_cast %265 : vector<8xf32> to vector<8x1xf32>
    %267 = vector.extract_strided_slice %47 {offsets = [56, 0], sizes = [8, 8], strides = [1, 1]} : vector<64x8xf32> to vector<8x8xf32>
    %268 = arith.mulf %235, %267 : vector<8x8xf32>
    %cst_74 = arith.constant dense<0.000000e+00> : vector<8xf32>
    %269 = vector.multi_reduction <add>, %268, %cst_74 [1] : vector<8x8xf32> to vector<8xf32>
    %270 = vector.shape_cast %269 : vector<8xf32> to vector<8x1xf32>
    %271 = tpu.concatenate %242, %246, %250, %254, %258, %262, %266, %270 in 1 : vector<8x1xf32>, vector<8x1xf32>, vector<8x1xf32>, vector<8x1xf32>, vector<8x1xf32>, vector<8x1xf32>, vector<8x1xf32>, vector<8x1xf32> -> vector<8x8xf32>
    %272 = arith.addf %238, %271 : vector<8x8xf32>
    %273 = vector.broadcast %54 : vector<1x8xf32> to vector<8x8xf32>
    %274 = arith.addf %272, %273 : vector<8x8xf32>
    %cst_75 = arith.constant dense<0xFF800000> : vector<8xf32>
    %275 = vector.multi_reduction <maximumf>, %274, %cst_75 [1] : vector<8x8xf32> to vector<8xf32>
    %276 = vector.shape_cast %275 : vector<8xf32> to vector<8x1xf32>
    %277 = vector.broadcast %276 : vector<8x1xf32> to vector<8x8xf32>
    %278 = arith.subf %274, %277 : vector<8x8xf32>
    %279 = math.exp %278 : vector<8x8xf32>
    %cst_76 = arith.constant dense<0.000000e+00> : vector<8xf32>
    %280 = vector.multi_reduction <add>, %279, %cst_76 [1] : vector<8x8xf32> to vector<8xf32>
    %281 = vector.shape_cast %280 : vector<8xf32> to vector<8x1xf32>
    %282 = vector.broadcast %281 : vector<8x1xf32> to vector<8x8xf32>
    %283 = arith.divf %279, %282 : vector<8x8xf32>
    %cst_77 = arith.constant dense<0.000000e+00> : vector<8x8xf32>
    %284 = tpu.matmul %283, %237, %cst_77 {dimension_numbers = #tpu.dot_dimension_numbers<[1], [0], [0], [1], [0, 0, 1, 1], [], []>} : vector<8x8xf32>, vector<8x8xf32>, vector<8x8xf32> -> vector<8x8xf32>
    %285 = vector.extract_strided_slice %52 {offsets = [0, 0], sizes = [8, 8], strides = [1, 1]} : vector<64x8xf32> to vector<8x8xf32>
    %286 = vector.extract_strided_slice %283 {offsets = [0, 0], sizes = [8, 1], strides = [1, 1]} : vector<8x8xf32> to vector<8x1xf32>
    %287 = vector.broadcast %286 : vector<8x1xf32> to vector<8x8xf32>
    %288 = arith.mulf %287, %285 : vector<8x8xf32>
    %289 = arith.addf %284, %288 : vector<8x8xf32>
    %290 = vector.extract_strided_slice %52 {offsets = [8, 0], sizes = [8, 8], strides = [1, 1]} : vector<64x8xf32> to vector<8x8xf32>
    %291 = vector.extract_strided_slice %283 {offsets = [0, 1], sizes = [8, 1], strides = [1, 1]} : vector<8x8xf32> to vector<8x1xf32>
    %292 = vector.broadcast %291 : vector<8x1xf32> to vector<8x8xf32>
    %293 = arith.mulf %292, %290 : vector<8x8xf32>
    %294 = arith.addf %289, %293 : vector<8x8xf32>
    %295 = vector.extract_strided_slice %52 {offsets = [16, 0], sizes = [8, 8], strides = [1, 1]} : vector<64x8xf32> to vector<8x8xf32>
    %296 = vector.extract_strided_slice %283 {offsets = [0, 2], sizes = [8, 1], strides = [1, 1]} : vector<8x8xf32> to vector<8x1xf32>
    %297 = vector.broadcast %296 : vector<8x1xf32> to vector<8x8xf32>
    %298 = arith.mulf %297, %295 : vector<8x8xf32>
    %299 = arith.addf %294, %298 : vector<8x8xf32>
    %300 = vector.extract_strided_slice %52 {offsets = [24, 0], sizes = [8, 8], strides = [1, 1]} : vector<64x8xf32> to vector<8x8xf32>
    %301 = vector.extract_strided_slice %283 {offsets = [0, 3], sizes = [8, 1], strides = [1, 1]} : vector<8x8xf32> to vector<8x1xf32>
    %302 = vector.broadcast %301 : vector<8x1xf32> to vector<8x8xf32>
    %303 = arith.mulf %302, %300 : vector<8x8xf32>
    %304 = arith.addf %299, %303 : vector<8x8xf32>
    %305 = vector.extract_strided_slice %52 {offsets = [32, 0], sizes = [8, 8], strides = [1, 1]} : vector<64x8xf32> to vector<8x8xf32>
    %306 = vector.extract_strided_slice %283 {offsets = [0, 4], sizes = [8, 1], strides = [1, 1]} : vector<8x8xf32> to vector<8x1xf32>
    %307 = vector.broadcast %306 : vector<8x1xf32> to vector<8x8xf32>
    %308 = arith.mulf %307, %305 : vector<8x8xf32>
    %309 = arith.addf %304, %308 : vector<8x8xf32>
    %310 = vector.extract_strided_slice %52 {offsets = [40, 0], sizes = [8, 8], strides = [1, 1]} : vector<64x8xf32> to vector<8x8xf32>
    %311 = vector.extract_strided_slice %283 {offsets = [0, 5], sizes = [8, 1], strides = [1, 1]} : vector<8x8xf32> to vector<8x1xf32>
    %312 = vector.broadcast %311 : vector<8x1xf32> to vector<8x8xf32>
    %313 = arith.mulf %312, %310 : vector<8x8xf32>
    %314 = arith.addf %309, %313 : vector<8x8xf32>
    %315 = vector.extract_strided_slice %52 {offsets = [48, 0], sizes = [8, 8], strides = [1, 1]} : vector<64x8xf32> to vector<8x8xf32>
    %316 = vector.extract_strided_slice %283 {offsets = [0, 6], sizes = [8, 1], strides = [1, 1]} : vector<8x8xf32> to vector<8x1xf32>
    %317 = vector.broadcast %316 : vector<8x1xf32> to vector<8x8xf32>
    %318 = arith.mulf %317, %315 : vector<8x8xf32>
    %319 = arith.addf %314, %318 : vector<8x8xf32>
    %320 = vector.extract_strided_slice %52 {offsets = [56, 0], sizes = [8, 8], strides = [1, 1]} : vector<64x8xf32> to vector<8x8xf32>
    %321 = vector.extract_strided_slice %283 {offsets = [0, 7], sizes = [8, 1], strides = [1, 1]} : vector<8x8xf32> to vector<8x1xf32>
    %322 = vector.broadcast %321 : vector<8x1xf32> to vector<8x8xf32>
    %323 = arith.mulf %322, %320 : vector<8x8xf32>
    %324 = arith.addf %319, %323 : vector<8x8xf32>
    %325 = vector.extract_strided_slice %18 {offsets = [0, 24], sizes = [8, 8], strides = [1, 1]} : vector<8x32xf32> to vector<8x8xf32>
    %326 = vector.extract_strided_slice %11 {offsets = [0, 24], sizes = [8, 8], strides = [1, 1]} : vector<8x32xf32> to vector<8x8xf32>
    %327 = vector.extract_strided_slice %16 {offsets = [0, 24], sizes = [8, 8], strides = [1, 1]} : vector<8x32xf32> to vector<8x8xf32>
    %cst_78 = arith.constant dense<0.000000e+00> : vector<8x8xf32>
    %328 = tpu.matmul %325, %326, %cst_78 {dimension_numbers = #tpu.dot_dimension_numbers<[1], [1], [0], [0], [0, 0, 1, 0], [], []>} : vector<8x8xf32>, vector<8x8xf32>, vector<8x8xf32> -> vector<8x8xf32>
    %329 = vector.extract_strided_slice %47 {offsets = [0, 0], sizes = [8, 8], strides = [1, 1]} : vector<64x8xf32> to vector<8x8xf32>
    %330 = arith.mulf %325, %329 : vector<8x8xf32>
    %cst_79 = arith.constant dense<0.000000e+00> : vector<8xf32>
    %331 = vector.multi_reduction <add>, %330, %cst_79 [1] : vector<8x8xf32> to vector<8xf32>
    %332 = vector.shape_cast %331 : vector<8xf32> to vector<8x1xf32>
    %333 = vector.extract_strided_slice %47 {offsets = [8, 0], sizes = [8, 8], strides = [1, 1]} : vector<64x8xf32> to vector<8x8xf32>
    %334 = arith.mulf %325, %333 : vector<8x8xf32>
    %cst_80 = arith.constant dense<0.000000e+00> : vector<8xf32>
    %335 = vector.multi_reduction <add>, %334, %cst_80 [1] : vector<8x8xf32> to vector<8xf32>
    %336 = vector.shape_cast %335 : vector<8xf32> to vector<8x1xf32>
    %337 = vector.extract_strided_slice %47 {offsets = [16, 0], sizes = [8, 8], strides = [1, 1]} : vector<64x8xf32> to vector<8x8xf32>
    %338 = arith.mulf %325, %337 : vector<8x8xf32>
    %cst_81 = arith.constant dense<0.000000e+00> : vector<8xf32>
    %339 = vector.multi_reduction <add>, %338, %cst_81 [1] : vector<8x8xf32> to vector<8xf32>
    %340 = vector.shape_cast %339 : vector<8xf32> to vector<8x1xf32>
    %341 = vector.extract_strided_slice %47 {offsets = [24, 0], sizes = [8, 8], strides = [1, 1]} : vector<64x8xf32> to vector<8x8xf32>
    %342 = arith.mulf %325, %341 : vector<8x8xf32>
    %cst_82 = arith.constant dense<0.000000e+00> : vector<8xf32>
    %343 = vector.multi_reduction <add>, %342, %cst_82 [1] : vector<8x8xf32> to vector<8xf32>
    %344 = vector.shape_cast %343 : vector<8xf32> to vector<8x1xf32>
    %345 = vector.extract_strided_slice %47 {offsets = [32, 0], sizes = [8, 8], strides = [1, 1]} : vector<64x8xf32> to vector<8x8xf32>
    %346 = arith.mulf %325, %345 : vector<8x8xf32>
    %cst_83 = arith.constant dense<0.000000e+00> : vector<8xf32>
    %347 = vector.multi_reduction <add>, %346, %cst_83 [1] : vector<8x8xf32> to vector<8xf32>
    %348 = vector.shape_cast %347 : vector<8xf32> to vector<8x1xf32>
    %349 = vector.extract_strided_slice %47 {offsets = [40, 0], sizes = [8, 8], strides = [1, 1]} : vector<64x8xf32> to vector<8x8xf32>
    %350 = arith.mulf %325, %349 : vector<8x8xf32>
    %cst_84 = arith.constant dense<0.000000e+00> : vector<8xf32>
    %351 = vector.multi_reduction <add>, %350, %cst_84 [1] : vector<8x8xf32> to vector<8xf32>
    %352 = vector.shape_cast %351 : vector<8xf32> to vector<8x1xf32>
    %353 = vector.extract_strided_slice %47 {offsets = [48, 0], sizes = [8, 8], strides = [1, 1]} : vector<64x8xf32> to vector<8x8xf32>
    %354 = arith.mulf %325, %353 : vector<8x8xf32>
    %cst_85 = arith.constant dense<0.000000e+00> : vector<8xf32>
    %355 = vector.multi_reduction <add>, %354, %cst_85 [1] : vector<8x8xf32> to vector<8xf32>
    %356 = vector.shape_cast %355 : vector<8xf32> to vector<8x1xf32>
    %357 = vector.extract_strided_slice %47 {offsets = [56, 0], sizes = [8, 8], strides = [1, 1]} : vector<64x8xf32> to vector<8x8xf32>
    %358 = arith.mulf %325, %357 : vector<8x8xf32>
    %cst_86 = arith.constant dense<0.000000e+00> : vector<8xf32>
    %359 = vector.multi_reduction <add>, %358, %cst_86 [1] : vector<8x8xf32> to vector<8xf32>
    %360 = vector.shape_cast %359 : vector<8xf32> to vector<8x1xf32>
    %361 = tpu.concatenate %332, %336, %340, %344, %348, %352, %356, %360 in 1 : vector<8x1xf32>, vector<8x1xf32>, vector<8x1xf32>, vector<8x1xf32>, vector<8x1xf32>, vector<8x1xf32>, vector<8x1xf32>, vector<8x1xf32> -> vector<8x8xf32>
    %362 = arith.addf %328, %361 : vector<8x8xf32>
    %363 = vector.broadcast %54 : vector<1x8xf32> to vector<8x8xf32>
    %364 = arith.addf %362, %363 : vector<8x8xf32>
    %cst_87 = arith.constant dense<0xFF800000> : vector<8xf32>
    %365 = vector.multi_reduction <maximumf>, %364, %cst_87 [1] : vector<8x8xf32> to vector<8xf32>
    %366 = vector.shape_cast %365 : vector<8xf32> to vector<8x1xf32>
    %367 = vector.broadcast %366 : vector<8x1xf32> to vector<8x8xf32>
    %368 = arith.subf %364, %367 : vector<8x8xf32>
    %369 = math.exp %368 : vector<8x8xf32>
    %cst_88 = arith.constant dense<0.000000e+00> : vector<8xf32>
    %370 = vector.multi_reduction <add>, %369, %cst_88 [1] : vector<8x8xf32> to vector<8xf32>
    %371 = vector.shape_cast %370 : vector<8xf32> to vector<8x1xf32>
    %372 = vector.broadcast %371 : vector<8x1xf32> to vector<8x8xf32>
    %373 = arith.divf %369, %372 : vector<8x8xf32>
    %cst_89 = arith.constant dense<0.000000e+00> : vector<8x8xf32>
    %374 = tpu.matmul %373, %327, %cst_89 {dimension_numbers = #tpu.dot_dimension_numbers<[1], [0], [0], [1], [0, 0, 1, 1], [], []>} : vector<8x8xf32>, vector<8x8xf32>, vector<8x8xf32> -> vector<8x8xf32>
    %375 = vector.extract_strided_slice %52 {offsets = [0, 0], sizes = [8, 8], strides = [1, 1]} : vector<64x8xf32> to vector<8x8xf32>
    %376 = vector.extract_strided_slice %373 {offsets = [0, 0], sizes = [8, 1], strides = [1, 1]} : vector<8x8xf32> to vector<8x1xf32>
    %377 = vector.broadcast %376 : vector<8x1xf32> to vector<8x8xf32>
    %378 = arith.mulf %377, %375 : vector<8x8xf32>
    %379 = arith.addf %374, %378 : vector<8x8xf32>
    %380 = vector.extract_strided_slice %52 {offsets = [8, 0], sizes = [8, 8], strides = [1, 1]} : vector<64x8xf32> to vector<8x8xf32>
    %381 = vector.extract_strided_slice %373 {offsets = [0, 1], sizes = [8, 1], strides = [1, 1]} : vector<8x8xf32> to vector<8x1xf32>
    %382 = vector.broadcast %381 : vector<8x1xf32> to vector<8x8xf32>
    %383 = arith.mulf %382, %380 : vector<8x8xf32>
    %384 = arith.addf %379, %383 : vector<8x8xf32>
    %385 = vector.extract_strided_slice %52 {offsets = [16, 0], sizes = [8, 8], strides = [1, 1]} : vector<64x8xf32> to vector<8x8xf32>
    %386 = vector.extract_strided_slice %373 {offsets = [0, 2], sizes = [8, 1], strides = [1, 1]} : vector<8x8xf32> to vector<8x1xf32>
    %387 = vector.broadcast %386 : vector<8x1xf32> to vector<8x8xf32>
    %388 = arith.mulf %387, %385 : vector<8x8xf32>
    %389 = arith.addf %384, %388 : vector<8x8xf32>
    %390 = vector.extract_strided_slice %52 {offsets = [24, 0], sizes = [8, 8], strides = [1, 1]} : vector<64x8xf32> to vector<8x8xf32>
    %391 = vector.extract_strided_slice %373 {offsets = [0, 3], sizes = [8, 1], strides = [1, 1]} : vector<8x8xf32> to vector<8x1xf32>
    %392 = vector.broadcast %391 : vector<8x1xf32> to vector<8x8xf32>
    %393 = arith.mulf %392, %390 : vector<8x8xf32>
    %394 = arith.addf %389, %393 : vector<8x8xf32>
    %395 = vector.extract_strided_slice %52 {offsets = [32, 0], sizes = [8, 8], strides = [1, 1]} : vector<64x8xf32> to vector<8x8xf32>
    %396 = vector.extract_strided_slice %373 {offsets = [0, 4], sizes = [8, 1], strides = [1, 1]} : vector<8x8xf32> to vector<8x1xf32>
    %397 = vector.broadcast %396 : vector<8x1xf32> to vector<8x8xf32>
    %398 = arith.mulf %397, %395 : vector<8x8xf32>
    %399 = arith.addf %394, %398 : vector<8x8xf32>
    %400 = vector.extract_strided_slice %52 {offsets = [40, 0], sizes = [8, 8], strides = [1, 1]} : vector<64x8xf32> to vector<8x8xf32>
    %401 = vector.extract_strided_slice %373 {offsets = [0, 5], sizes = [8, 1], strides = [1, 1]} : vector<8x8xf32> to vector<8x1xf32>
    %402 = vector.broadcast %401 : vector<8x1xf32> to vector<8x8xf32>
    %403 = arith.mulf %402, %400 : vector<8x8xf32>
    %404 = arith.addf %399, %403 : vector<8x8xf32>
    %405 = vector.extract_strided_slice %52 {offsets = [48, 0], sizes = [8, 8], strides = [1, 1]} : vector<64x8xf32> to vector<8x8xf32>
    %406 = vector.extract_strided_slice %373 {offsets = [0, 6], sizes = [8, 1], strides = [1, 1]} : vector<8x8xf32> to vector<8x1xf32>
    %407 = vector.broadcast %406 : vector<8x1xf32> to vector<8x8xf32>
    %408 = arith.mulf %407, %405 : vector<8x8xf32>
    %409 = arith.addf %404, %408 : vector<8x8xf32>
    %410 = vector.extract_strided_slice %52 {offsets = [56, 0], sizes = [8, 8], strides = [1, 1]} : vector<64x8xf32> to vector<8x8xf32>
    %411 = vector.extract_strided_slice %373 {offsets = [0, 7], sizes = [8, 1], strides = [1, 1]} : vector<8x8xf32> to vector<8x1xf32>
    %412 = vector.broadcast %411 : vector<8x1xf32> to vector<8x8xf32>
    %413 = arith.mulf %412, %410 : vector<8x8xf32>
    %414 = arith.addf %409, %413 : vector<8x8xf32>
    %415 = tpu.concatenate %144, %234, %324, %414 in 1 : vector<8x8xf32>, vector<8x8xf32>, vector<8x8xf32>, vector<8x8xf32> -> vector<8x32xf32>
    %c0_90 = arith.constant 0 : index
    %c0_91 = arith.constant 0 : index
    %416 = vector.load %arg14[%c0_90, %c0_91] : memref<32x32xf32, #tpu.memory_space<vmem>>, vector<32x32xf32>
    %cst_92 = arith.constant dense<0.000000e+00> : vector<8x32xf32>
    %417 = tpu.matmul %415, %416, %cst_92 {dimension_numbers = #tpu.dot_dimension_numbers<[1], [0], [0], [1], [0, 0, 1, 1], [], []>} : vector<8x32xf32>, vector<32x32xf32>, vector<8x32xf32> -> vector<8x32xf32>
    %c0_93 = arith.constant 0 : index
    %c0_94 = arith.constant 0 : index
    %418 = vector.load %arg15[%c0_93, %c0_94] : memref<1x32xf32, #tpu.memory_space<vmem>>, vector<1x32xf32>
    %419 = vector.broadcast %418 : vector<1x32xf32> to vector<8x32xf32>
    %420 = arith.addf %417, %419 : vector<8x32xf32>
    %cst_95 = arith.constant 0.000000e+00 : f32
    %421 = vector.broadcast %cst_95 : f32 to vector<8x32xf32>
    %422 = arith.maximumf %420, %421 : vector<8x32xf32>
    %423 = arith.addf %1, %422 : vector<8x32xf32>
    %cst_96 = arith.constant dense<0.000000e+00> : vector<8xf32>
    %424 = vector.multi_reduction <add>, %423, %cst_96 [1] : vector<8x32xf32> to vector<8xf32>
    %425 = vector.shape_cast %424 : vector<8xf32> to vector<8x1xf32>
    %cst_97 = arith.constant 3.200000e+01 : f32
    %426 = vector.broadcast %cst_97 : f32 to vector<8x1xf32>
    %427 = arith.divf %425, %426 : vector<8x1xf32>
    %428 = vector.broadcast %427 : vector<8x1xf32> to vector<8x32xf32>
    %429 = arith.subf %423, %428 : vector<8x32xf32>
    %430 = arith.mulf %429, %429 : vector<8x32xf32>
    %cst_98 = arith.constant dense<0.000000e+00> : vector<8xf32>
    %431 = vector.multi_reduction <add>, %430, %cst_98 [1] : vector<8x32xf32> to vector<8xf32>
    %432 = vector.shape_cast %431 : vector<8xf32> to vector<8x1xf32>
    %cst_99 = arith.constant 3.200000e+01 : f32
    %433 = vector.broadcast %cst_99 : f32 to vector<8x1xf32>
    %434 = arith.divf %432, %433 : vector<8x1xf32>
    %cst_100 = arith.constant 9.99999974E-6 : f32
    %435 = vector.broadcast %cst_100 : f32 to vector<8x1xf32>
    %436 = arith.addf %434, %435 : vector<8x1xf32>
    %437 = math.rsqrt %436 : vector<8x1xf32>
    %438 = vector.broadcast %437 : vector<8x1xf32> to vector<8x32xf32>
    %439 = arith.mulf %429, %438 : vector<8x32xf32>
    %c0_101 = arith.constant 0 : index
    %c0_102 = arith.constant 0 : index
    %440 = vector.load %arg18[%c0_101, %c0_102] : memref<1x32xf32, #tpu.memory_space<vmem>>, vector<1x32xf32>
    %441 = vector.broadcast %440 : vector<1x32xf32> to vector<8x32xf32>
    %442 = arith.mulf %439, %441 : vector<8x32xf32>
    %c0_103 = arith.constant 0 : index
    %c0_104 = arith.constant 0 : index
    %443 = vector.load %arg19[%c0_103, %c0_104] : memref<1x32xf32, #tpu.memory_space<vmem>>, vector<1x32xf32>
    %444 = vector.broadcast %443 : vector<1x32xf32> to vector<8x32xf32>
    %445 = arith.addf %442, %444 : vector<8x32xf32>
    %c0_105 = arith.constant 0 : index
    %c0_106 = arith.constant 0 : index
    %c0_107 = arith.constant 0 : index
    %446 = vector.load %arg20[%c0_105, %c0_106, %c0_107] : memref<1x8x32xf32, #tpu.memory_space<vmem>>, vector<1x8x32xf32>
    %447 = vector.shape_cast %446 : vector<1x8x32xf32> to vector<8x32xf32>
    %448 = vector.shape_cast %445 : vector<8x32xf32> to vector<1x8x32xf32>
    tpu.vector_store %arg20[%c0_105, %c0_106, %c0_107], %448 {strides = array<i32>} : memref<1x8x32xf32, #tpu.memory_space<vmem>>, vector<1x8x32xf32>,
    return
  }
  func.func @transform_0(%arg0: i32) -> (i32, i32, i32) {
    %c0_i32 = arith.constant 0 : i32
    %c0_i32_0 = arith.constant 0 : i32
    %c0_i32_1 = arith.constant 0 : i32
    return %arg0, %c0_i32, %c0_i32_0 : i32, i32, i32
  }
  func.func @transform_1(%arg0: i32) -> (i32, i32, i32) {
    %c0_i32 = arith.constant 0 : i32
    %c0_i32_0 = arith.constant 0 : i32
    %c0_i32_1 = arith.constant 0 : i32
    return %arg0, %c0_i32, %c0_i32_0 : i32, i32, i32
  }
  func.func @transform_2(%arg0: i32) -> (i32, i32, i32) {
    %c0_i32 = arith.constant 0 : i32
    %c0_i32_0 = arith.constant 0 : i32
    %c0_i32_1 = arith.constant 0 : i32
    return %arg0, %c0_i32, %c0_i32_0 : i32, i32, i32
  }
  func.func @transform_3(%arg0: i32) -> (i32, i32) {
    %c0_i32 = arith.constant 0 : i32
    %c0_i32_0 = arith.constant 0 : i32
    %c0_i32_1 = arith.constant 0 : i32
    return %c0_i32, %c0_i32_0 : i32, i32
  }
  func.func @transform_4(%arg0: i32) -> (i32, i32) {
    %c0_i32 = arith.constant 0 : i32
    %c0_i32_0 = arith.constant 0 : i32
    %c0_i32_1 = arith.constant 0 : i32
    return %c0_i32, %c0_i32_0 : i32, i32
  }
  func.func @transform_5(%arg0: i32) -> (i32, i32) {
    %c0_i32 = arith.constant 0 : i32
    %c0_i32_0 = arith.constant 0 : i32
    %c0_i32_1 = arith.constant 0 : i32
    return %c0_i32, %c0_i32_0 : i32, i32
  }
  func.func @transform_6(%arg0: i32) -> (i32, i32) {
    %c0_i32 = arith.constant 0 : i32
    %c0_i32_0 = arith.constant 0 : i32
    %c0_i32_1 = arith.constant 0 : i32
    return %c0_i32, %c0_i32_0 : i32, i32
  }
  func.func @transform_7(%arg0: i32) -> (i32, i32) {
    %c0_i32 = arith.constant 0 : i32
    %c0_i32_0 = arith.constant 0 : i32
    %c0_i32_1 = arith.constant 0 : i32
    return %c0_i32, %c0_i32_0 : i32, i32
  }
  func.func @transform_8(%arg0: i32) -> (i32, i32) {
    %c0_i32 = arith.constant 0 : i32
    %c0_i32_0 = arith.constant 0 : i32
    %c0_i32_1 = arith.constant 0 : i32
    return %c0_i32, %c0_i32_0 : i32, i32
  }
  func.func @transform_9(%arg0: i32) -> (i32, i32) {
    %c0_i32 = arith.constant 0 : i32
    %c0_i32_0 = arith.constant 0 : i32
    %c0_i32_1 = arith.constant 0 : i32
    return %c0_i32, %c0_i32_0 : i32, i32
  }
  func.func @transform_10(%arg0: i32) -> (i32, i32) {
    %c0_i32 = arith.constant 0 : i32
    %c0_i32_0 = arith.constant 0 : i32
    %c0_i32_1 = arith.constant 0 : i32
    return %c0_i32, %c0_i32_0 : i32, i32
  }
  func.func @transform_11(%arg0: i32) -> (i32, i32) {
    %c0_i32 = arith.constant 0 : i32
    %c0_i32_0 = arith.constant 0 : i32
    %c0_i32_1 = arith.constant 0 : i32
    return %c0_i32, %c0_i32_0 : i32, i32
  }
  func.func @transform_12(%arg0: i32) -> (i32, i32) {
    %c0_i32 = arith.constant 0 : i32
    %c0_i32_0 = arith.constant 0 : i32
    %c0_i32_1 = arith.constant 0 : i32
    return %c0_i32, %c0_i32_0 : i32, i32
  }
  func.func @transform_13(%arg0: i32) -> (i32, i32) {
    %c0_i32 = arith.constant 0 : i32
    %c0_i32_0 = arith.constant 0 : i32
    %c0_i32_1 = arith.constant 0 : i32
    return %c0_i32, %c0_i32_0 : i32, i32
  }
  func.func @transform_14(%arg0: i32) -> (i32, i32) {
    %c0_i32 = arith.constant 0 : i32
    %c0_i32_0 = arith.constant 0 : i32
    %c0_i32_1 = arith.constant 0 : i32
    return %c0_i32, %c0_i32_0 : i32, i32
  }
  func.func @transform_15(%arg0: i32) -> (i32, i32) {
    %c0_i32 = arith.constant 0 : i32
    %c0_i32_0 = arith.constant 0 : i32
    %c0_i32_1 = arith.constant 0 : i32
    return %c0_i32, %c0_i32_0 : i32, i32
  }
  func.func @transform_16(%arg0: i32) -> (i32, i32) {
    %c0_i32 = arith.constant 0 : i32
    %c0_i32_0 = arith.constant 0 : i32
    %c0_i32_1 = arith.constant 0 : i32
    return %c0_i32, %c0_i32_0 : i32, i32
  }
  func.func @transform_17(%arg0: i32) -> (i32, i32) {
    %c0_i32 = arith.constant 0 : i32
    %c0_i32_0 = arith.constant 0 : i32
    %c0_i32_1 = arith.constant 0 : i32
    return %c0_i32, %c0_i32_0 : i32, i32
  }
  func.func @transform_18(%arg0: i32) -> (i32, i32) {
    %c0_i32 = arith.constant 0 : i32
    %c0_i32_0 = arith.constant 0 : i32
    %c0_i32_1 = arith.constant 0 : i32
    return %c0_i32, %c0_i32_0 : i32, i32
  }
  func.func @transform_19(%arg0: i32) -> (i32, i32, i32) {
    %c0_i32 = arith.constant 0 : i32
    %c0_i32_0 = arith.constant 0 : i32
    %c0_i32_1 = arith.constant 0 : i32
    return %arg0, %c0_i32, %c0_i32_0 : i32, i32, i32
  }
}

</mosaic_0001>

<bundles_post_ra>
// kernel: structure_aware_attention.1
= control target key start
LH: loop header
LB: loop body
LE: loop exit
PB: predicated region body
PF: predicated region fallthrough
CT: control target
= control target key end

     0   :  { %s3935_s0 = inlined_call_operand.vmem [shape: f32[2,8,32], index: 0, kind: input, shape index: {}]   ;;  %s3936_s1 = inlined_call_operand.vmem [shape: f32[2,1,8], index: 1, kind: input, shape index: {}]   ;;  %s3937_s2 = inlined_call_operand.vmem [shape: f32[2,64,16], index: 2, kind: input, shape index: {}]   ;;  %s3938_s3 = inlined_call_operand.vmem [shape: f32[32,32], index: 3, kind: input, shape index: {}]   ;;  %s3939_s4 = inlined_call_operand.vmem [shape: f32[1,32], index: 4, kind: input, shape index: {}]   ;;  %s3940_s5 = inlined_call_operand.vmem [shape: f32[32,32], index: 5, kind: input, shape index: {}]   ;;  %s3941_s6 = inlined_call_operand.vmem [shape: f32[1,32], index: 6, kind: input, shape index: {}]   ;;  %s3942_s7 = inlined_call_operand.vmem [shape: f32[32,32], index: 7, kind: input, shape index: {}]   ;;  %s3943_s8 = inlined_call_operand.vmem [shape: f32[1,32], index: 8, kind: input, shape index: {}]   ;;  %s3944_s9 = inlined_call_operand.vmem [shape: f32[16,8], index: 9, kind: input, shape index: {}]   ;;  %s3945_s10 = inlined_call_operand.vmem [shape: f32[1,8], index: 10, kind: input, shape index: {}]   ;;  %s3946_s11 = inlined_call_operand.vmem [shape: f32[16,8], index: 11, kind: input, shape index: {}]   ;;  %s3947_s12 = inlined_call_operand.vmem [shape: f32[1,8], index: 12, kind: input, shape index: {}]   ;;  %s3948_s13 = inlined_call_operand.vmem [shape: f32[32,32], index: 13, kind: input, shape index: {}]   ;;  %s3949_s14 = inlined_call_operand.vmem [shape: f32[1,32], index: 14, kind: input, shape index: {}]   ;;  %s3950_s15 = inlined_call_operand.vmem [shape: f32[1,16], index: 15, kind: input, shape index: {}]   ;;  %s3951_s16 = inlined_call_operand.vmem [shape: f32[1,16], index: 16, kind: input, shape index: {}]   ;;  %s3952_s17 = inlined_call_operand.vmem [shape: f32[1,32], index: 17, kind: input, shape index: {}]   ;;  %s3953_s18 = inlined_call_operand.vmem [shape: f32[1,32], index: 18, kind: input, shape index: {}]   ;;  %s3954_s19 = inlined_call_operand.hbm [shape: f32[2,8,32], index: 19, kind: output, shape index: {}]  }
   0x1   :  { %3963 = sst [smem:[#allocation11_spill]] %s3935_s0 }
   0x2   :  { %3964 = sst [smem:[#allocation12_spill]] %s3936_s1 }
   0x3   :  { %3965 = sst [smem:[#allocation13_spill]] %s3937_s2 }
   0x4   :  { %3966 = sst [smem:[#allocation14_spill]] %s3938_s3 }
   0x5   :  { %24 = vsyncpa [#allocation3], 0 }
   0x6   :  { %26 = vsyncpa [#allocation3 + $0x1], 0  ;;  %s3267_s0 = smov 0   ;;  %s3269_s30 = smov 0  }
   0x7   :  { %s3271_s20 = smov 0   ;;  %s3273_s21 = smov 0  }
   0x8 LB: > { %3967 = sst [smem:[#allocation5_spill]] %s3135_s0  ;;  %s3288_s1 = sadd.s32 4294967295, %s3147_s21   ;;  %s3147_s21 = sphi %s3273_s21, %s3983_s21   ;;  %s3143_s20 = sphi %s3271_s20, %s3985_s20   ;;  %s3139_s30 = sphi %s3269_s30, %s3987_s30   ;;  %s3135_s0 = sphi %s3267_s0, %s3986_s0  }
   0x9   : > { %3968 = sst [smem:[#allocation6_spill]] %s3143_s20  ;;  %s2699_s22 = sadd.s32 4294967294, %s3147_s21  }
   0xa   : > { %3969 = sst [smem:[#allocation7_spill]] %s3147_s21  ;;  %s3292_s2 = sadd.s32 1, %s3147_s21  }
   0xb   : > { %3970 = sst [smem:[#allocation8_spill]] %s3292_s2  ;;  %s453_s23 = sadd.s32 1, %s3143_s20 }
   0xc   : > { %s450_s24 = ssub.s32 %s3147_s21, %s3292_s2  ;;  %p463_p0 = scmp.ne.s32.totalorder %s3143_s20, %s3139_s30 }
   0xd   : > { %p451_p1 = scmp.eq.s32.totalorder %s450_s24, 0  ;;  %p464_p2 = scmp.eq.s32.totalorder %s3288_s1, 1 }
   0xe   : > { %p469_p3 = scmp.ne.s32.totalorder %s3139_s30, %s3135_s0  ;;  %p470_p4 = scmp.eq.s32.totalorder %s2699_s22, 1 }
   0xf   : > { %s3303_s25 = scalar_select %p451_p1, %s3143_s20, %s453_s23  }
  0x10   : > { %p3305_p5 = por %p464_p2, %p463_p0  ;;  %p3309_p6 = por %p470_p4, %p469_p3 }
  0x11   : > { %3971 = sst [smem:[#allocation9_spill]] %s3303_s25  ;;  %p2702_p7 = scmp.ge.s32.totalorder %s3147_s21, 1 }
  0x12   : > { %s3973_s26 = scalar_select %p3309_p6, 1, 0 }
  0x13   : > { %p557_p8 = scmp.lt.s32.totalorder %s3147_s21, 3 }
  0x14   : > { %3974 = sst [smem:[#allocation10_spill]] %s3973_s26 }
  0x15   : > { %p558_p9 = pnand %p2702_p7, %p557_p8 }
  0x16   : > { %p620_p10 = scmp.lt.s32.totalorder (!%p558_p9), %s3288_s1, 1  ;;  %vm889_vm0 = vcmask (!%p558_p9), 130048   ;;  %s3975_s23 = sld [smem:[#allocation13_spill]] (!%p558_p9)  ;;  %v718_v56 = vld [vmem:[%s3940_s5] sm:$0xff] (!%p558_p9)  ;;  %v719_v57 = vld [vmem:[%s3940_s5 + $0x8] sm:$0xff] (!%p558_p9)  ;;  %v3149_v59 = vmov (!%p558_p9), 0.0|0.0  }
  0x17   : > { %561 = sbr.rel (%p558_p9) target bundleno = 2476 (0x9ac), region = 96  ;;  %v2934_v58 = vpack.c.bf16 (!%p558_p9), %v719_v57, %v718_v56  ;;  %2933 = vmatprep.subr.bf16.mxu1 (!%p558_p9), %v3149_v59  ;;  %2927 = vmatprep.subr.bf16.mxu0 (!%p558_p9), %v3149_v59  ;;  %s3976_s20 = sld [smem:[#allocation14_spill]] (!%p558_p9)  ;;  %v720_v63 = vld [vmem:[%s3940_s5 + $0x10] sm:$0xff] (!%p558_p9)  ;;  %vm3150_vm1 = vmmov (!%p558_p9), 0   ;;  %vm644_vm2 = vcmask (!%p558_p9), 261120   ;;  %vm1279_vm3 = vcmask (!%p558_p9), 64512  }
  0x18   : > { %s3978_s21 = sld [smem:[#allocation11_spill]] (!%p558_p9)  ;;  %s3152_s26 = smov (!%p558_p9), 112   ;;  %vm1311_vm4 = vcmask (!%p558_p9), 7168   ;;  %vm1313_vm5 = vcmask (!%p558_p9), 15360   ;;  %vm1315_vm6 = vcmask (!%p558_p9), 23552   ;;  %vm1317_vm7 = vcmask (!%p558_p9), 31744  }
  0x19   : > { %2935 = vmatpush3.bf16.msra.mxu1 (!%p558_p9), %v2934_v58  ;;  %s3157_s25 = smov (!%p558_p9), 24   ;;  %vm1319_vm8 = vcmask (!%p558_p9), 39936   ;;  %vm1321_vm9 = vcmask (!%p558_p9), 48128   ;;  %vm1323_vm10 = vcmask (!%p558_p9), 56320   ;;  %s3979_s22 = sld [smem:[#allocation12_spill]] (!%p558_p9)  ;;  %vm2486_vm11 = vcmask (!%p558_p9), 195584  }
  0x1a   : > { %2936 = vmatprep.subr.bf16.mxu1 (!%p558_p9), %v3149_v59 }
  0x1d   : > { %s3977_s2 = smov (!%p558_p9), %s3976_s20  ;;  %v633_v60 = vld [vmem:[%s3976_s20] sm:$0xff] (!%p558_p9)  ;;  %s3155_s20 = smov (!%p558_p9), 8  }
  0x1e   : > { %s3317_s27 = scalar_select %p620_p10, %s3288_s1, 1  ;;  %v634_v61 = vld [vmem:[%s3977_s2 + $0x8] sm:$0xff] }
  0x1f   : > { %v2928_v62 = vpack.c.bf16 %v634_v61, %v633_v60 }
  0x20   : > { %s2754_s28 = sshll.u32 %s3317_s27, 6 }
  0x21   : > { %s631_s24 = scalar_lea.vmem %s3975_s23, %s2754_s28  ;;  %2929 = vmatpush3.bf16.msra.mxu0 %v2928_v62  ;;  %s2704_s28 = sshll.u32 %s3317_s27, 3 }
  0x22   : > { %v881_v0 = vld [vmem:[%s631_s24] sm:$0xff]  ;;  %v883_v1 = vld [vmem:[%s631_s24 + $0x10] sm:$0xff]  ;;  %v882_v2 = vld [vmem:[%s631_s24 + $0x8] sm:$0xff]  ;;  %2930 = vmatprep.subr.bf16.mxu0 %v3149_v59  ;;  %s3403_s0 = scalar_lea.vmem %s3978_s21, %s2704_s28  ;;  %s3156_s21 = smov 16  }
  0x23   : > { %v890_v3 = vsel %vm889_vm0, %v881_v0, 0.0  ;;  %v896_v4 = vsel %vm889_vm0, %v883_v1, 0.0  ;;  %v884_v5 = vld [vmem:[%s631_s24 + $0x18] sm:$0xff]  ;;  %v893_v6 = vsel %vm889_vm0, %v882_v2, 0.0  ;;  %v885_v8 = vld [vmem:[%s631_s24 + $0x20] sm:$0xff]  ;;  %v886_v9 = vld [vmem:[%s631_s24 + $0x28] sm:$0xff]  ;;  %s626_s23 = scalar_lea.vmem %s3979_s22, %s3317_s27 }
  0x24   : > { %891 = vadd.xlane.f32.xlu0 %v890_v3  ;;  %897 = vadd.xlane.f32.xlu1 %v896_v4  ;;  %v899_v7 = vsel %vm889_vm0, %v884_v5, 0.0  ;;  %v902_v10 = vsel %vm889_vm0, %v885_v8, 0.0  ;;  %v905_v11 = vsel %vm889_vm0, %v886_v9, 0.0  ;;  %v887_v12 = vld [vmem:[%s631_s24 + $0x30] sm:$0xff]  ;;  %v888_v13 = vld [vmem:[%s631_s24 + $0x38] sm:$0xff]  ;;  %s3153_s24 = smov 120  }
  0x25   : > { %v908_v14 = vsel %vm889_vm0, %v887_v12, 0.0  ;;  %v911_v15 = vsel %vm889_vm0, %v888_v13, 0.0  ;;  %v636_v3 = vld [vmem:[%s3977_s2 + $0x18] sm:$0xff]  ;;  %s2751_s22 = sshll.u32 %s3288_s1, 7  ;;  %s3166_s1 = smov [#allocation2]  }
  0x28   : > { %894 = vadd.xlane.f32.xlu0 %v893_v6  ;;  %900 = vadd.xlane.f32.xlu1 %v899_v7  ;;  %v632_v6 = vld [vmem:[%s3403_s0] sm:$0xff] }
  0x29   : > { %v799_v7 = vld [vmem:[%s3942_s7] sm:$0xff] }
  0x2c   : > { %903 = vadd.xlane.f32.xlu0 %v902_v10  ;;  %906 = vadd.xlane.f32.xlu1 %v905_v11  ;;  %v801_v10 = vld [vmem:[%s3942_s7 + $0x10] sm:$0xff]  ;;  %v802_v11 = vld [vmem:[%s3942_s7 + $0x18] sm:$0xff] }
  0x30   : > { %909 = vadd.xlane.f32.xlu0 %v908_v14  ;;  %912 = vadd.xlane.f32.xlu1 %v911_v15  ;;  %v1026_v14 = vld [vmem:[%s3944_s9 + $0x8] sm:$0xff] }
  0xb1   : > { %v892_v16 = vpop.xlane.xlu0 %891  ;;  %v898_v17 = vpop.xlane.xlu1 %897 }
  0xb2   : > { %v915_v18 = vmul.f32 0.0625, %v892_v16  ;;  %v917_v19 = vmul.f32 0.0625, %v898_v17  ;;  %v1163_v16 = vld [vmem:[%s3946_s11] sm:$0xff]  ;;  %v1164_v17 = vld [vmem:[%s3946_s11 + $0x8] sm:$0xff] }
  0xb4   : > { %v3331_v20 = vsub.f32 %v881_v0, %v915_v18  ;;  %v3333_v21 = vsub.f32 %v883_v1, %v917_v19  ;;  %v721_v0 = vld [vmem:[%s3940_s5 + $0x18] sm:$0xff]  ;;  %v3441_v18 = vpack.c.bf16 %v1164_v17, %v1163_v16  ;;  %v2707_v17 = vld [vmem:[%s3939_s4] ss:$0 sm:$0xff] }
  0xb5   : > { %v895_v22 = vpop.xlane.xlu0 %894  ;;  %v901_v23 = vpop.xlane.xlu1 %900  ;;  %v2937_v1 = vpack.c.bf16 %v721_v0, %v720_v63 }
  0xb6   : > { %v916_v24 = vmul.f32 0.0625, %v895_v22  ;;  %v918_v25 = vmul.f32 0.0625, %v901_v23  ;;  %v931_v26 = vmul.f32 %v3331_v20, %v3331_v20  ;;  %v933_v27 = vmul.f32 %v3333_v21, %v3333_v21 }
  0xb7   : > { %2938 = vmatpush3.bf16.msra.mxu1 %v2937_v1 }
  0xb8   : > { %v3339_v28 = vsub.f32 %v882_v2, %v916_v24  ;;  %v3341_v29 = vsub.f32 %v884_v5, %v918_v25  ;;  %v939_v30 = vsel %vm889_vm0, %v931_v26, 0.0  ;;  %v945_v33 = vsel %vm889_vm0, %v933_v27, 0.0  ;;  %v635_v2 = vld [vmem:[%s3977_s2 + $0x10] sm:$0xff]  ;;  %s3154_s2 = smov 104  }
  0xb9   : > { %940 = vadd.xlane.f32.xlu0 %v939_v30  ;;  %v904_v31 = vpop.xlane.xlu0 %903  ;;  %v907_v32 = vpop.xlane.xlu1 %906  ;;  %v2931_v4 = vpack.c.bf16 %v636_v3, %v635_v2  ;;  %v3151_v5 = vmov 0.0  }
  0xba   : > { %v919_v34 = vmul.f32 0.0625, %v904_v31  ;;  %v920_v35 = vmul.f32 0.0625, %v907_v32  ;;  %v932_v36 = vmul.f32 %v3339_v28, %v3339_v28  ;;  %v934_v37 = vmul.f32 %v3341_v29, %v3341_v29  ;;  %2830 = vmatprep.mubr.msk.f32.mxu1 %vm3150_vm1, %v3151_v5  ;;  %2819 = vmatprep.mubr.msk.f32.mxu0 %vm3150_vm1, %v3151_v5 }
  0xbb   : > { %2932 = vmatpush3.bf16.msra.mxu0 %v2931_v4  ;;  %2831 = vmatmul.mubr.msk.f32.vlgmr.msra.gmra.mrb[0].mxu1 %vm644_vm2, %v632_v6 }
  0xbc   : > { %v3349_v38 = vsub.f32 %v885_v8, %v919_v34  ;;  %v3351_v39 = vsub.f32 %v886_v9, %v920_v35  ;;  %v942_v40 = vsel %vm889_vm0, %v932_v36, 0.0  ;;  %v948_v43 = vsel %vm889_vm0, %v934_v37, 0.0  ;;  %2939 = vmatprep.subr.bf16.mxu0 %v3149_v59  ;;  %v800_v8 = vld [vmem:[%s3942_s7 + $0x8] sm:$0xff] }
  0xbd   : > { %946 = vadd.xlane.f32.xlu0 %v945_v33  ;;  %943 = vadd.xlane.f32.xlu1 %v942_v40  ;;  %v910_v41 = vpop.xlane.xlu0 %909  ;;  %v913_v42 = vpop.xlane.xlu1 %912  ;;  %v2940_v9 = vpack.c.bf16 %v800_v8, %v799_v7 }
  0xbe   : > { %v921_v44 = vmul.f32 0.0625, %v910_v41  ;;  %v922_v45 = vmul.f32 0.0625, %v913_v42  ;;  %v935_v46 = vmul.f32 %v3349_v38, %v3349_v38  ;;  %v936_v47 = vmul.f32 %v3351_v39, %v3351_v39  ;;  %2820 = vmatmul.mubr.msk.f32.vlgmr.msra.gmra.mrb[0].mxu0 %vm644_vm2, %v632_v6 }
  0xbf   : > { %2841 = vmatprep.mubr.msk.f32.mxu0 %vm3150_vm1, %v3151_v5  ;;  %2941 = vmatpush3.bf16.msra.mxu0 %v2940_v9 }
  0xc0   : > { %v3359_v48 = vsub.f32 %v887_v12, %v921_v44  ;;  %v3361_v49 = vsub.f32 %v888_v13, %v922_v45  ;;  %v951_v50 = vsel %vm889_vm0, %v935_v46, 0.0  ;;  %v954_v51 = vsel %vm889_vm0, %v936_v47, 0.0  ;;  %2942 = vmatprep.subr.bf16.mxu0 %v3149_v59  ;;  %v1025_v13 = vld [vmem:[%s3944_s9] sm:$0xff] }
  0xc1   : > { %949 = vadd.xlane.f32.xlu1 %v948_v43  ;;  %952 = vadd.xlane.f32.xlu0 %v951_v50  ;;  %v2943_v12 = vpack.c.bf16 %v802_v11, %v801_v10  ;;  %v2945_v15 = vpack.c.bf16 %v1026_v14, %v1025_v13  ;;  %v2713_v47 = vld [vmem:[%s3950_s15] ss:$0 sm:$0xff] }
  0xc2   : > { %v937_v52 = vmul.f32 %v3359_v48, %v3359_v48  ;;  %v938_v53 = vmul.f32 %v3361_v49, %v3361_v49 }
  0xc3   : > { %2944 = vmatpush3.bf16.msra.mxu0 %v2943_v12  ;;  %2946 = vmatprep.subr.bf16.mxu1 %v2945_v15 }
  0xc4   : > { %v957_v54 = vsel %vm889_vm0, %v937_v52, 0.0  ;;  %v960_v55 = vsel %vm889_vm0, %v938_v53, 0.0  ;;  %2948 = vmatpush3.bf16.msra.mxu1 %v2945_v15  ;;  %2950 = vmatprep.subr.bf16.mxu0 %v3441_v18  ;;  %v2714_v53 = vld [vmem:[%s3951_s16] ss:$0 sm:$0xff] }
  0xc5   : > { %955 = vadd.xlane.f32.xlu1 %v954_v51  ;;  %958 = vadd.xlane.f32.xlu0 %v957_v54 }
  0xc6   : > { %2842 = vmatmul.mubr.msk.f32.vlgmr.msra.gmra.mrb[2].mxu0 %vm644_vm2, %v632_v6  ;;  %2959 = vmatprep.subr.bf16.mxu1 %v3441_v18 }
  0xc7   : > { %2952 = vmatpush3.bf16.msra.mxu0 %v3441_v18 }
  0xc8   : > { %2886 = vmatprep.subr.mxu0 %v3151_v5 }
  0xc9   : > { %961 = vadd.xlane.f32.xlu1 %v960_v55 }
 0x146   : > { %v941_v19 = vpop.xlane.xlu0 %940 }
 0x147   : > { %v963_v22 = vmul.f32 0.0625, %v941_v19 }
 0x149   : > { %v971_v23 = vadd.f32 1e-05, %v963_v22 }
 0x14a   : > { %v944_v24 = vpop.xlane.xlu1 %943  ;;  %v947_v25 = vpop.xlane.xlu0 %946 }
 0x14b   : > { %3050 = vrsqrt.f32 %v971_v23  ;;  %v964_v26 = vmul.f32 0.0625, %v944_v24  ;;  %v965_v27 = vmul.f32 0.0625, %v947_v25 }
 0x14d   : > { %v972_v30 = vadd.f32 1e-05, %v964_v26  ;;  %v973_v31 = vadd.f32 1e-05, %v965_v27  ;;  %v2711_v26 = vld [vmem:[%s3943_s8] ss:$0 sm:$0xff] }
 0x14e   : > { %v950_v32 = vpop.xlane.xlu1 %949  ;;  %v953_v33 = vpop.xlane.xlu0 %952 }
 0x14f   : > { %3052 = vrsqrt.f32 %v972_v30  ;;  %v966_v34 = vmul.f32 0.0625, %v950_v32  ;;  %v967_v35 = vmul.f32 0.0625, %v953_v33 }
 0x150   : > { %3054 = vrsqrt.f32 %v973_v31 }
 0x151   : > { %v974_v36 = vadd.f32 1e-05, %v966_v34  ;;  %v975_v37 = vadd.f32 1e-05, %v967_v35 }
 0x152   : > { %v956_v40 = vpop.xlane.xlu1 %955  ;;  %v959_v41 = vpop.xlane.xlu0 %958 }
 0x153   : > { %3056 = vrsqrt.f32 %v974_v36  ;;  %v968_v42 = vmul.f32 0.0625, %v956_v40  ;;  %v969_v43 = vmul.f32 0.0625, %v959_v41  ;;  %v2715_v40 = vld [vmem:[%s3945_s10] ss:$0 sm:$0xff] }
 0x154   : > { %3058 = vrsqrt.f32 %v975_v37 }
 0x155   : > { %v3051_v44 = vpop.eup %3050  ;;  %v976_v45 = vadd.f32 1e-05, %v968_v42  ;;  %v977_v46 = vadd.f32 1e-05, %v969_v43 }
 0x156   : > { %v962_v50 = vpop.xlane.xlu1 %961  ;;  %v987_v51 = vmul.f32 %v3051_v44, %v3331_v20 }
 0x157   : > { %3060 = vrsqrt.f32 %v976_v45  ;;  %v970_v52 = vmul.f32 0.0625, %v962_v50 }
 0x158   : > { %3062 = vrsqrt.f32 %v977_v46  ;;  %v1002_v54 = vmul.f32 %v2713_v47, %v987_v51 }
 0x159   : > { %v3053_v55 = vpop.eup %3052  ;;  %v978_v56 = vadd.f32 1e-05, %v970_v52 }
 0x15a   : > { %v3055_v57 = vpop.eup %3054  ;;  %v988_v58 = vmul.f32 %v3053_v55, %v3339_v28  ;;  %v1017_v60 = vadd.f32 %v2714_v53, %v1002_v54 }
 0x15b   : > { %3064 = vrsqrt.f32 %v978_v56  ;;  %v989_v61 = vmul.f32 %v3055_v57, %v3333_v21 }
 0x15c   : > { %2848 = vmatprep.mubr.msk.f32.mxu1 %vm889_vm0, %v1017_v60  ;;  %2864 = vmatprep.mubr.msk.f32.mxu0 %vm889_vm0, %v1017_v60  ;;  %v1003_v20 = vmul.f32 %v2713_v47, %v988_v58 }
 0x15d   : > { %v3057_v62 = vpop.eup %3056  ;;  %v1004_v63 = vmul.f32 %v2713_v47, %v989_v61 }
 0x15e   : > { %v3059_v0 = vpop.eup %3058  ;;  %v1018_v1 = vadd.f32 %v2714_v53, %v1003_v20  ;;  %v990_v2 = vmul.f32 %v3057_v62, %v3341_v29 }
 0x15f   : > { %v1019_v3 = vadd.f32 %v2714_v53, %v1004_v63  ;;  %v991_v4 = vmul.f32 %v3059_v0, %v3349_v38 }
 0x160   : > { %2849 = vmatmul.mubr.msk.f32.vlgmr.msra.gmra.mrb[2].mxu1 %vm889_vm0, %v1018_v1  ;;  %2865 = vmatmul.mubr.msk.f32.vlgmr.msra.gmra.mrb[4].mxu0 %vm889_vm0, %v1018_v1  ;;  %v1005_v28 = vmul.f32 %v2713_v47, %v990_v2 }
 0x161   : > { %v3061_v21 = vpop.eup %3060  ;;  %2851 = vmatprep.mubr.msk.f32.mxu1 %vm889_vm0, %v1019_v3  ;;  %2867 = vmatprep.mubr.msk.f32.mxu0 %vm889_vm0, %v1019_v3  ;;  %v1006_v6 = vmul.f32 %v2713_v47, %v991_v4 }
 0x162   : > { %v3063_v7 = vpop.eup %3062  ;;  %v1020_v8 = vadd.f32 %v2714_v53, %v1005_v28  ;;  %v992_v9 = vmul.f32 %v3061_v21, %v3351_v39  ;;  %2960 = vmatpush3.bf16.msra.mxu1 %v3441_v18 }
 0x163   : > { %v1021_v29 = vadd.f32 %v2714_v53, %v1006_v6  ;;  %v993_v38 = vmul.f32 %v3063_v7, %v3359_v48  ;;  %2876 = vmatprep.subr.mxu1 %v3151_v5 }
 0x164   : > { %2852 = vmatmul.mubr.msk.f32.gmra.mrb[4].mxu1 %vm889_vm0, %v1020_v8  ;;  %2868 = vmatmul.mubr.msk.f32.gmra.mrb[6].mxu0 %vm889_vm0, %v1020_v8  ;;  %v1007_v10 = vmul.f32 %v2713_v47, %v992_v9 }
 0x165   : > { %v3065_v11 = vpop.eup %3064  ;;  %2854 = vmatprep.mubr.msk.f32.mxu1 %vm889_vm0, %v1021_v29  ;;  %2870 = vmatprep.mubr.msk.f32.mxu0 %vm889_vm0, %v1021_v29  ;;  %v1008_v12 = vmul.f32 %v2713_v47, %v993_v38 }
 0x166   : > { %v1022_v13 = vadd.f32 %v2714_v53, %v1007_v10  ;;  %v994_v39 = vmul.f32 %v3065_v11, %v3361_v49  ;;  %v2709_v49 = vld [vmem:[%s3941_s6] ss:$0 sm:$0xff] }
 0x167   : > { %v1023_v14 = vadd.f32 %v2714_v53, %v1008_v12 }
 0x168   : > { %2855 = vmatmul.mubr.msk.f32.gmra.mrb[6].mxu1 %vm889_vm0, %v1022_v13  ;;  %2871 = vmatmul.mubr.msk.f32.gmra.mrb[8].mxu0 %vm889_vm0, %v1022_v13  ;;  %v1009_v48 = vmul.f32 %v2713_v47, %v994_v39 }
 0x169   : > { %2857 = vmatprep.mubr.msk.f32.mxu1 %vm889_vm0, %v1023_v14  ;;  %2888 = vmatprep.mubr.msk.f32.mxu0 %vm3150_vm1, %v3151_v5 }
 0x16a   : > { %v1024_v15 = vadd.f32 %v2714_v53, %v1009_v48 }
 0x16c   : > { %2858 = vmatmul.mubr.msk.f32.gmra.mrb[8].mxu1 %vm889_vm0, %v1024_v15 }
 0x16d   : > { %2873 = vmatprep.mubr.msk.f32.mxu1 %vm889_vm0, %v1023_v14 }
 0x170   : > { %2874 = vmatmul.mubr.msk.f32.vlgmr.msra.gmra.mrb[10].mxu1 %vm889_vm0, %v1024_v15 }
 0x171   : > { %2878 = vmatprep.mubr.msk.f32.mxu1 %vm3150_vm1, %v3151_v5 }
 0x18e   : > { %v795_v16 = vpop.f32.mrb[0].mxu1 }
 0x18f   : > { %v796_v18 = vadd.f32 %v2709_v49, %v795_v16  ;;  %v2832_v19 = vpop.f32.mrb[1].mxu1 }
 0x191   : > { %v714_v22 = vpop.f32.mrb[0].mxu0  ;;  %1953 = vrot.lane.b32.xlu1 %v796_v18, %s3152_s26  ;;  %1644 = vrot.lane.b32.xlu0 %v796_v18, %s3153_s24 }
 0x192   : > { %v715_v23 = vadd.f32 %v2707_v17, %v714_v22  ;;  %v2821_v24 = vpop.f32.mrb[1].mxu0  ;;  %2877 = vmatpush3.xpose.msk.msra.mxu1 %vm1279_vm3, %v796_v18 }
 0x193   : > { %2881 = vmatprep.subr.mxu1 %v3151_v5 }
 0x194   : > { %v3492_v25 = vmul.f32 0.35355338, %v715_v23 }
 0x195   : > { %2261 = vrot.lane.b32.xlu0 %v796_v18, %s3154_s2 }
 0x196   : > { %1642 = vrot.lane.b32.xlu1 %v3492_v25, %s3153_s24  ;;  %2879 = vmatmul.mubr.msk.f32.vlgmr.msra.gmra.mrb[12].mxu1 %vm1279_vm3, %v3492_v25 }
 0x197   : > { %2883 = vmatprep.mubr.msk.f32.mxu1 %vm3150_vm1, %v3151_v5 }
 0x199   : > { %v876_v27 = vpop.f32.mrb[2].mxu0 }
 0x19a   : > { %1951 = vrot.lane.b32.xlu1 %v3492_v25, %s3152_s26  ;;  %v3507_v30 = vadd.f32 %v2711_v26, %v876_v27  ;;  %v2843_v31 = vpop.f32.mrb[3].mxu0 }
 0x19c   : > { %2882 = vmatpush3.msra.mxu1 %v3507_v30 }
 0x19d   : > { %2891 = vmatprep.subr.mxu1 %v3151_v5 }
 0x19e   : > { %2259 = vrot.lane.b32.xlu1 %v3492_v25, %s3154_s2 }
 0x203   : > { %v1954_v32 = vpop.permute.xlu1 %1953  ;;  %v1645_v33 = vpop.permute.xlu0 %1644 }
 0x204   : > { %2887 = vmatpush3.xpose.msk.msra.mxu0 %vm1279_vm3, %v1645_v33 }
 0x205   : > { %2896 = vmatprep.subr.mxu0 %v3151_v5 }
 0x207   : > { %v2262_v35 = vpop.permute.xlu0 %2261 }
 0x208   : > { %v1643_v34 = vpop.permute.xlu1 %1642 }
 0x209   : > { %2889 = vmatmul.mubr.msk.f32.vlgmr.msra.gmra.mrb[10].mxu0 %vm1279_vm3, %v1643_v34 }
 0x20a   : > { %2897 = vmatpush3.xpose.msk.msra.mxu0 %vm1279_vm3, %v1954_v32  ;;  %2898 = vmatprep.mubr.msk.f32.mxu0 %vm3150_vm1, %v3151_v5 }
 0x20b   : > { %2906 = vmatprep.subr.mxu0 %v3151_v5 }
 0x20c   : > { %v1952_v36 = vpop.permute.xlu1 %1951 }
 0x20d   : > { %2899 = vmatmul.mubr.msk.f32.vlgmr.msra.gmra.mrb[12].mxu0 %vm1279_vm3, %v1952_v36 }
 0x20e   : > { %2907 = vmatpush3.xpose.msk.msra.mxu0 %vm1279_vm3, %v2262_v35  ;;  %2908 = vmatprep.mubr.msk.f32.mxu0 %vm3150_vm1, %v3151_v5 }
 0x20f   : > { %2953 = vmatprep.subr.bf16.mxu0 %v3149_v59 }
 0x210   : > { %v2260_v37 = vpop.permute.xlu1 %2259 }
 0x211   : > { %2909 = vmatmul.mubr.msk.f32.vlgmr.msra.gmra.mrb[14].mxu0 %vm1279_vm3, %v2260_v37 }
 0x212   : > { %2924 = vmatprep.mubr.msk.f32.mxu0 %vm3150_vm1, %v3151_v5 }
 0x233   : > { %v2850_v41 = vpop.f32.mrb[2].mxu1  ;;  %v3531_v42 = vpop.f32.mrb[4].mxu0 }
 0x234   : > { %v1130_v43 = vadd.f32 %v2850_v41, %v2715_v40  ;;  %v1124_v44 = vpop.f32.mrb[3].mxu1  ;;  %v3533_v45 = vpop.f32.mrb[5].mxu0 }
 0x235   : > { %v1125_v46 = vadd.f32 %v2715_v40, %v1124_v44 }
 0x236   : > { %1552 = vrot.lane.b32.xlu1 %v1130_v43, %s3155_s20  ;;  %v1283_v3 = vmul.f32 %v1130_v43, %v3492_v25 }
 0x237   : > { %v2853_v47 = vpop.f32.mrb[4].mxu1  ;;  %1540 = vrot.lane.b32.xlu0 %v1125_v46, %s3155_s20  ;;  %v3537_v50 = vpop.f32.mrb[6].mxu0  ;;  %v1278_v1 = vmul.f32 %v1125_v46, %v3492_v25 }
 0x238   : > { %v1134_v51 = vpop.f32.mrb[5].mxu1  ;;  %v3539_v52 = vpop.f32.mrb[7].mxu0  ;;  %v1284_v4 = vsel %vm1279_vm3, %v1283_v3, 0.0  ;;  %v1140_v28 = vadd.f32 %v2853_v47, %v2715_v40 }
 0x239   : > { %v1280_v2 = vsel %vm1279_vm3, %v1278_v1, 0.0  ;;  %v1135_v21 = vadd.f32 %v2715_v40, %v1134_v51 }
 0x23a   : > { %1867 = vrot.lane.b32.xlu1 %v1130_v43, %s3156_s21  ;;  %v1291_v6 = vmul.f32 %v1140_v28, %v3492_v25 }
 0x23b   : > { %v2856_v53 = vpop.f32.mrb[6].mxu1  ;;  %1856 = vrot.lane.b32.xlu0 %v1125_v46, %s3156_s21  ;;  %v3543_v54 = vpop.f32.mrb[8].mxu0  ;;  %v1287_v8 = vmul.f32 %v1135_v21, %v3492_v25 }
 0x23c   : > { %v1150_v55 = vadd.f32 %v2856_v53, %v2715_v40  ;;  %v1144_v56 = vpop.f32.mrb[7].mxu1  ;;  %v3545_v57 = vpop.f32.mrb[9].mxu0  ;;  %v1292_v7 = vsel %vm1279_vm3, %v1291_v6, 0.0 }
 0x23d   : > { %v1145_v58 = vadd.f32 %v2715_v40, %v1144_v56  ;;  %v1288_v9 = vsel %vm1279_vm3, %v1287_v8, 0.0 }
 0x23e   : > { %2175 = vrot.lane.b32.xlu1 %v1130_v43, %s3157_s25  ;;  %v1299_v10 = vmul.f32 %v1150_v55, %v3492_v25 }
 0x23f   : > { %v2859_v60 = vpop.f32.mrb[8].mxu1  ;;  %2164 = vrot.lane.b32.xlu0 %v1125_v46, %s3157_s25  ;;  %v1295_v49 = vmul.f32 %v1145_v58, %v3492_v25 }
 0x240   : > { %v3549_v61 = vadd.f32 %v2859_v60, %v2715_v40  ;;  %v1154_v20 = vpop.f32.mrb[9].mxu1  ;;  %v1300_v11 = vsel %vm1279_vm3, %v1299_v10, 0.0 }
 0x241   : > { %v3551_v62 = vadd.f32 %v2715_v40, %v1154_v20  ;;  %v1296_v16 = vsel %vm1279_vm3, %v1295_v49, 0.0 }
 0x242   : > { %v1307_v60 = vmul.f32 %v3549_v61, %v3492_v25 }
 0x243   : > { %v3553_v63 = vpop.f32.mrb[10].mxu1 }
 0x244   : > { %v3555_v0 = vpop.f32.mrb[11].mxu1  ;;  %v1308_v1 = vsel %vm1279_vm3, %v1307_v60, 0.0 }
 0x25e   : > { %1281 = vadd.xlane.f32.xlu0 %v1280_v2  ;;  %v1303_v2 = vmul.f32 %v3551_v62, %v3492_v25 }
 0x262   : > { %1285 = vadd.xlane.f32.xlu1 %v1284_v4  ;;  %v1304_v4 = vsel %vm1279_vm3, %v1303_v2, 0.0 }
 0x269   : > { %v3577_v29 = vpop.f32.mrb[12].mxu1 }
 0x26a   : > { %v2880_v38 = vpop.f32.mrb[13].mxu1 }
 0x273   : > { %1576 = vrot.lane.b32.xlu1 %v1140_v28, %s3155_s20 }
 0x274   : > { %1564 = vrot.lane.b32.xlu0 %v1135_v21, %s3155_s20 }
 0x277   : > { %1889 = vrot.lane.b32.xlu1 %v1140_v28, %s3156_s21 }
 0x27b   : > { %2197 = vrot.lane.b32.xlu1 %v1140_v28, %s3157_s25 }
 0x27f   : > { %1878 = vrot.lane.b32.xlu1 %v1135_v21, %s3156_s21 }
 0x283   : > { %2186 = vrot.lane.b32.xlu1 %v1135_v21, %s3157_s25 }
 0x287   : > { %1600 = vrot.lane.b32.xlu1 %v1150_v55, %s3155_s20 }
 0x28b   : > { %1911 = vrot.lane.b32.xlu1 %v1150_v55, %s3156_s21 }
 0x28f   : > { %2219 = vrot.lane.b32.xlu1 %v1150_v55, %s3157_s25 }
 0x293   : > { %2241 = vrot.lane.b32.xlu1 %v3549_v61, %s3157_s25  ;;  %1293 = vadd.xlane.f32.xlu0 %v1292_v7 }
 0x297   : > { %1289 = vadd.xlane.f32.xlu0 %v1288_v9 }
 0x2a8   : > { %v1553_v12 = vpop.permute.xlu1 %1552 }
 0x2a9   : > { %v1555_v39 = vmul.f32 %v1553_v12, %v3492_v25  ;;  %v1541_v53 = vpop.permute.xlu0 %1540 }
 0x2aa   : > { %v1543_v8 = vmul.f32 %v1541_v53, %v3492_v25 }
 0x2ac   : > { %v1868_v13 = vpop.permute.xlu1 %1867 }
 0x2ad   : > { %1588 = vrot.lane.b32.xlu0 %v1145_v58, %s3155_s20  ;;  %v1870_v14 = vmul.f32 %v1868_v13, %v3492_v25  ;;  %v1857_v20 = vpop.permute.xlu0 %1856 }
 0x2b0   : > { %v2176_v48 = vpop.permute.xlu1 %2175 }
 0x2b1   : > { %1900 = vrot.lane.b32.xlu0 %v1145_v58, %s3156_s21  ;;  %v2178_v15 = vmul.f32 %v2176_v48, %v3492_v25  ;;  %v2165_v3 = vpop.permute.xlu0 %2164 }
 0x2b5   : > { %2208 = vrot.lane.b32.xlu0 %v1145_v58, %s3157_s25 }
 0x2b7   : > { %1301 = vadd.xlane.f32.xlu1 %v1300_v11 }
 0x2b9   : > { %1624 = vrot.lane.b32.xlu0 %v3549_v61, %s3155_s20 }
 0x2bd   : > { %1933 = vrot.lane.b32.xlu0 %v3549_v61, %s3156_s21  ;;  %v1859_v61 = vmul.f32 %v1857_v20, %v3492_v25 }
 0x2c8   : > { %1557 = vrot.lane.b32.xlu1 %v1555_v39, %s3153_s24 }
 0x2cc   : > { %1872 = vrot.lane.b32.xlu1 %v1870_v14, %s3152_s26 }
 0x2d0   : > { %2180 = vrot.lane.b32.xlu1 %v2178_v15, %s3154_s2 }
 0x2dc   : > { %1297 = vadd.xlane.f32.xlu0 %v1296_v16  ;;  %v3614_v36 = vpop.f32.mrb[10].mxu0 }
 0x2dd   : > { %v2890_v37 = vpop.f32.mrb[11].mxu0 }
 0x2e0   : > { %v3617_v41 = vpop.f32.mrb[12].mxu0 }
 0x2e1   : > { %v2900_v44 = vpop.f32.mrb[13].mxu0 }
 0x2e4   : > { %v3620_v46 = vpop.f32.mrb[14].mxu0 }
 0x2e5   : > { %v2910_v47 = vpop.f32.mrb[15].mxu0 }
 0x2eb   : > { %v1282_v28 = vpop.xlane.xlu0 %1281 }
 0x2ef   : > { %v3595_v17 = vpop.xlane.xlu1 %1285  ;;  %v1565_v21 = vpop.permute.xlu0 %1564 }
 0x2f0   : > { %v1567_v10 = vmul.f32 %v1565_v21, %v3492_v25 }
 0x2f2   : > { %1612 = vrot.lane.b32.xlu0 %v3551_v62, %s3155_s20 }
 0x2f3   : > { %v1577_v18 = vpop.permute.xlu1 %1576 }
 0x2f4   : > { %v1579_v19 = vmul.f32 %v1577_v18, %v3492_v25 }
 0x2f6   : > { %1581 = vrot.lane.b32.xlu1 %v1579_v19, %s3153_s24  ;;  %1922 = vrot.lane.b32.xlu0 %v3551_v62, %s3156_s21 }
 0x2f7   : > { %v1890_v22 = vpop.permute.xlu1 %1889 }
 0x2f8   : > { %v1892_v23 = vmul.f32 %v1890_v22, %v3492_v25 }
 0x2fa   : > { %1894 = vrot.lane.b32.xlu1 %v1892_v23, %s3152_s26  ;;  %2230 = vrot.lane.b32.xlu0 %v3551_v62, %s3157_s25  ;;  %v2167_v62 = vmul.f32 %v2165_v3, %v3492_v25 }
 0x2fb   : > { %v2198_v24 = vpop.permute.xlu1 %2197 }
 0x2fc   : > { %v2200_v26 = vmul.f32 %v2198_v24, %v3492_v25 }
 0x2fe   : > { %2202 = vrot.lane.b32.xlu1 %v2200_v26, %s3154_s2 }
 0x2ff   : > { %v1879_v27 = vpop.permute.xlu1 %1878 }
 0x300   : > { %v1881_v31 = vmul.f32 %v1879_v27, %v3492_v25 }
 0x302   : > { %1883 = vrot.lane.b32.xlu1 %v1881_v31, %s3152_s26 }
 0x303   : > { %v2187_v32 = vpop.permute.xlu1 %2186 }
 0x304   : > { %v2189_v33 = vmul.f32 %v2187_v32, %v3492_v25 }
 0x306   : > { %2191 = vrot.lane.b32.xlu1 %v2189_v33, %s3154_s2 }
 0x307   : > { %v1601_v34 = vpop.permute.xlu1 %1600 }
 0x308   : > { %v1603_v35 = vmul.f32 %v1601_v34, %v3492_v25 }
 0x30a   : > { %1605 = vrot.lane.b32.xlu1 %v1603_v35, %s3153_s24 }
 0x30b   : > { %v1912_v40 = vpop.permute.xlu1 %1911 }
 0x30c   : > { %v1914_v43 = vmul.f32 %v1912_v40, %v3492_v25 }
 0x30e   : > { %1916 = vrot.lane.b32.xlu1 %v1914_v43, %s3152_s26 }
 0x30f   : > { %v2220_v51 = vpop.permute.xlu1 %2219 }
 0x310   : > { %v2222_v55 = vmul.f32 %v2220_v51, %v3492_v25 }
 0x312   : > { %2224 = vrot.lane.b32.xlu1 %v2222_v55, %s3154_s2  ;;  %v1312_v55 = vsel %vm1311_vm4, %v1282_v28, %v3595_v17 }
 0x313   : > { %v2242_v56 = vpop.permute.xlu1 %2241 }
 0x314   : > { %v2244_v58 = vmul.f32 %v2242_v56, %v3492_v25 }
 0x316   : > { %2246 = vrot.lane.b32.xlu1 %v2244_v58, %s3154_s2 }
 0x319   : > { %1309 = vadd.xlane.f32.xlu0 %v1308_v1 }
 0x31d   : > { %1305 = vadd.xlane.f32.xlu0 %v1304_v4 }
 0x320   : > { %v1294_v6 = vpop.xlane.xlu0 %1293 }
 0x324   : > { %v1290_v7 = vpop.xlane.xlu0 %1289 }
 0x325   : > { %v1314_v56 = vsel %vm1313_vm5, %v1312_v55, %v1290_v7 }
 0x326   : > { %v1316_v58 = vsel %vm1315_vm6, %v1314_v56, %v1294_v6 }
 0x328   : > { %v1589_v9 = vpop.permute.xlu0 %1588 }
 0x329   : > { %v1591_v11 = vmul.f32 %v1589_v9, %v3492_v25 }
 0x32c   : > { %v1901_v38 = vpop.permute.xlu0 %1900 }
 0x32d   : > { %v1903_v39 = vmul.f32 %v1901_v38, %v3492_v25 }
 0x330   : > { %v2209_v12 = vpop.permute.xlu0 %2208 }
 0x331   : > { %v2211_v15 = vmul.f32 %v2209_v12, %v3492_v25 }
 0x333   : > { %1545 = vrot.lane.b32.xlu0 %v1543_v8, %s3153_s24 }
 0x334   : > { %v1625_v14 = vpop.permute.xlu0 %1624 }
 0x335   : > { %v1627_v18 = vmul.f32 %v1625_v14, %v3492_v25 }
 0x337   : > { %1861 = vrot.lane.b32.xlu0 %v1859_v61, %s3152_s26 }
 0x338   : > { %v1934_v22 = vpop.permute.xlu0 %1933 }
 0x339   : > { %v1936_v24 = vmul.f32 %v1934_v22, %v3492_v25 }
 0x33b   : > { %2169 = vrot.lane.b32.xlu0 %v2167_v62, %s3154_s2 }
 0x33f   : > { %1569 = vrot.lane.b32.xlu0 %v1567_v10, %s3153_s24 }
 0x343   : > { %1593 = vrot.lane.b32.xlu0 %v1591_v11, %s3153_s24 }
 0x344   : > { %v1302_v13 = vpop.xlane.xlu1 %1301 }
 0x347   : > { %1905 = vrot.lane.b32.xlu0 %v1903_v39, %s3152_s26 }
 0x348   : > { %v1558_v48 = vpop.permute.xlu1 %1557 }
 0x349   : > { %v1560_v49 = vsel %vm1279_vm3, %v1558_v48, 0.0 }
 0x34a   : > { %1561 = vadd.xlane.f32.xlu1 %v1560_v49 }
 0x34b   : > { %2213 = vrot.lane.b32.xlu0 %v2211_v15, %s3154_s2 }
 0x34c   : > { %v1873_v16 = vpop.permute.xlu1 %1872 }
 0x34d   : > { %v1875_v19 = vsel %vm1279_vm3, %v1873_v16, 0.0 }
 0x34e   : > { %1876 = vadd.xlane.f32.xlu1 %v1875_v19 }
 0x34f   : > { %1629 = vrot.lane.b32.xlu0 %v1627_v18, %s3153_s24 }
 0x350   : > { %v2181_v23 = vpop.permute.xlu1 %2180 }
 0x351   : > { %v2183_v26 = vsel %vm1279_vm3, %v2181_v23, 0.0 }
 0x352   : > { %2184 = vadd.xlane.f32.xlu1 %v2183_v26 }
 0x353   : > { %1938 = vrot.lane.b32.xlu0 %v1936_v24, %s3152_s26 }
 0x368   : > { %v1582_v27 = vpop.permute.xlu1 %1581 }
 0x369   : > { %v1298_v31 = vpop.xlane.xlu0 %1297  ;;  %v1584_v32 = vsel %vm1279_vm3, %v1582_v27, 0.0 }
 0x36a   : > { %1585 = vadd.xlane.f32.xlu1 %v1584_v32  ;;  %v1318_v20 = vsel %vm1317_vm7, %v1316_v58, %v1298_v31 }
 0x36c   : > { %v1895_v33 = vpop.permute.xlu1 %1894 }
 0x36d   : > { %v1613_v34 = vpop.permute.xlu0 %1612  ;;  %v1897_v35 = vsel %vm1279_vm3, %v1895_v33, 0.0 }
 0x36e   : > { %v1615_v37 = vmul.f32 %v1613_v34, %v3492_v25  ;;  %1898 = vadd.xlane.f32.xlu1 %v1897_v35 }
 0x370   : > { %v2203_v40 = vpop.permute.xlu1 %2202  ;;  %1617 = vrot.lane.b32.xlu0 %v1615_v37, %s3153_s24 }
 0x371   : > { %v1923_v43 = vpop.permute.xlu0 %1922  ;;  %v2205_v44 = vsel %vm1279_vm3, %v2203_v40, 0.0  ;;  %v3693_v40 = vld [vmem:[%s626_s23] ss:$0 sm:$0xff] }
 0x372   : > { %v1925_v47 = vmul.f32 %v1923_v43, %v3492_v25  ;;  %2206 = vadd.xlane.f32.xlu1 %v2205_v44 }
 0x374   : > { %1927 = vrot.lane.b32.xlu0 %v1925_v47, %s3152_s26  ;;  %v1884_v21 = vpop.permute.xlu1 %1883 }
 0x375   : > { %v2231_v51 = vpop.permute.xlu0 %2230  ;;  %v1886_v11 = vsel %vm1279_vm3, %v1884_v21, 0.0 }
 0x376   : > { %v2233_v53 = vmul.f32 %v2231_v51, %v3492_v25  ;;  %v1320_v25 = vsel %vm1319_vm8, %v1318_v20, %v1302_v13 }
 0x378   : > { %2235 = vrot.lane.b32.xlu0 %v2233_v53, %s3154_s2  ;;  %v2192_v9 = vpop.permute.xlu1 %2191 }
 0x379   : > { %v2194_v39 = vsel %vm1279_vm3, %v2192_v9, 0.0 }
 0x37c   : > { %v1606_v10 = vpop.permute.xlu1 %1605 }
 0x37d   : > { %v1608_v49 = vsel %vm1279_vm3, %v1606_v10, 0.0 }
 0x380   : > { %v1917_v48 = vpop.permute.xlu1 %1916 }
 0x381   : > { %v1919_v22 = vsel %vm1279_vm3, %v1917_v48, 0.0 }
 0x384   : > { %v2225_v18 = vpop.permute.xlu1 %2224 }
 0x385   : > { %v2227_v26 = vsel %vm1279_vm3, %v2225_v18, 0.0 }
 0x388   : > { %v2247_v31 = vpop.permute.xlu1 %2246 }
 0x389   : > { %v2249_v32 = vsel %vm1279_vm3, %v2247_v31, 0.0 }
 0x3a6   : > { %v1310_v60 = vpop.xlane.xlu0 %1309 }
 0x3aa   : > { %v1306_v1 = vpop.xlane.xlu0 %1305 }
 0x3ab   : > { %v1322_v2 = vsel %vm1321_vm9, %v1320_v25, %v1306_v1 }
 0x3ac   : > { %v1324_v3 = vsel %vm1323_vm10, %v1322_v2, %v1310_v60 }
 0x3ad   : > { %v1398_v17 = vadd.f32 %v3577_v29, %v1324_v3 }
 0x3ae   : > { %v1546_v4 = vpop.permute.xlu0 %1545 }
 0x3af   : > { %v1548_v28 = vsel %vm1279_vm3, %v1546_v4, 0.0  ;;  %v1407_v47 = vadd.f32 %v3693_v40, %v1398_v17 }
 0x3b0   : > { %1549 = vadd.xlane.f32.xlu0 %v1548_v28 }
 0x3b1   : > { %v1408_v51 = vsel %vm1279_vm3, %v1407_v47, -inf }
 0x3b2   : > { %v1862_v6 = vpop.permute.xlu0 %1861 }
 0x3b3   : > { %v1864_v7 = vsel %vm1279_vm3, %v1862_v6, 0.0 }
 0x3b4   : > { %1865 = vadd.xlane.f32.xlu0 %v1864_v7 }
 0x3b6   : > { %v2170_v8 = vpop.permute.xlu0 %2169 }
 0x3b7   : > { %v2172_v61 = vsel %vm1279_vm3, %v2170_v8, 0.0 }
 0x3b8   : > { %2173 = vadd.xlane.f32.xlu0 %v2172_v61 }
 0x3ba   : > { %v1570_v62 = vpop.permute.xlu0 %1569 }
 0x3bb   : > { %v1572_v38 = vsel %vm1279_vm3, %v1570_v62, 0.0 }
 0x3bc   : > { %1573 = vadd.xlane.f32.xlu1 %v1572_v38 }
 0x3be   : > { %v1594_v29 = vpop.permute.xlu0 %1593 }
 0x3bf   : > { %v1596_v12 = vsel %vm1279_vm3, %v1594_v29, 0.0 }
 0x3c0   : > { %1887 = vadd.xlane.f32.xlu1 %v1886_v11  ;;  %1597 = vadd.xlane.f32.xlu0 %v1596_v12 }
 0x3c2   : > { %v1906_v13 = vpop.permute.xlu0 %1905 }
 0x3c3   : > { %v1908_v14 = vsel %vm1279_vm3, %v1906_v13, 0.0 }
 0x3c4   : > { %2195 = vadd.xlane.f32.xlu1 %v2194_v39  ;;  %1909 = vadd.xlane.f32.xlu0 %v1908_v14 }
 0x3c6   : > { %v2214_v15 = vpop.permute.xlu0 %2213 }
 0x3c7   : > { %v2216_v16 = vsel %vm1279_vm3, %v2214_v15, 0.0 }
 0x3c8   : > { %1609 = vadd.xlane.f32.xlu1 %v1608_v49  ;;  %2217 = vadd.xlane.f32.xlu0 %v2216_v16 }
 0x3ca   : > { %v1630_v19 = vpop.permute.xlu0 %1629 }
 0x3cb   : > { %v1632_v23 = vsel %vm1279_vm3, %v1630_v19, 0.0 }
 0x3cc   : > { %1920 = vadd.xlane.f32.xlu1 %v1919_v22  ;;  %1633 = vadd.xlane.f32.xlu0 %v1632_v23 }
 0x3ce   : > { %v1939_v24 = vpop.permute.xlu0 %1938 }
 0x3cf   : > { %v1941_v27 = vsel %vm1279_vm3, %v1939_v24, 0.0 }
 0x3d0   : > { %2228 = vadd.xlane.f32.xlu1 %v2227_v26  ;;  %1942 = vadd.xlane.f32.xlu0 %v1941_v27 }
 0x3d4   : > { %2250 = vadd.xlane.f32.xlu1 %v2249_v32 }
 0x3d7   : > { %v1562_v53 = vpop.xlane.xlu1 %1561 }
 0x3db   : > { %v1877_v55 = vpop.xlane.xlu1 %1876 }
 0x3df   : > { %v2185_v56 = vpop.xlane.xlu1 %2184 }
 0x3e2   : > { %v1618_v33 = vpop.permute.xlu0 %1617 }
 0x3e3   : > { %v1620_v34 = vsel %vm1279_vm3, %v1618_v33, 0.0 }
 0x3e4   : > { %1621 = vadd.xlane.f32.xlu0 %v1620_v34 }
 0x3e6   : > { %v1928_v35 = vpop.permute.xlu0 %1927 }
 0x3e7   : > { %v1930_v37 = vsel %vm1279_vm3, %v1928_v35, 0.0 }
 0x3e8   : > { %1931 = vadd.xlane.f32.xlu0 %v1930_v37 }
 0x3ea   : > { %v2236_v43 = vpop.permute.xlu0 %2235 }
 0x3eb   : > { %v2238_v44 = vsel %vm1279_vm3, %v2236_v43, 0.0 }
 0x3ec   : > { %2239 = vadd.xlane.f32.xlu0 %v2238_v44 }
 0x3f0   : > { %1409 = vmax.xlane.f32.xlu0 %v1408_v51 }
 0x3f7   : > { %v1586_v60 = vpop.xlane.xlu1 %1585 }
 0x3fb   : > { %v1899_v25 = vpop.xlane.xlu1 %1898 }
 0x3ff   : > { %v2207_v2 = vpop.xlane.xlu1 %2206 }
 0x43d   : > { %v1550_v58 = vpop.xlane.xlu0 %1549 }
 0x43e   : > { %v1635_v61 = vsel %vm1311_vm4, %v1550_v58, %v1562_v53 }
 0x441   : > { %v1866_v20 = vpop.xlane.xlu0 %1865 }
 0x442   : > { %v1944_v10 = vsel %vm1311_vm4, %v1866_v20, %v1877_v55 }
 0x445   : > { %v2174_v1 = vpop.xlane.xlu0 %2173 }
 0x446   : > { %v2252_v48 = vsel %vm1311_vm4, %v2174_v1, %v2185_v56 }
 0x449   : > { %v1574_v4 = vpop.xlane.xlu1 %1573 }
 0x44a   : > { %v1636_v9 = vsel %vm1313_vm5, %v1635_v61, %v1574_v4  ;;  %v3163_v61 = vmov 5  }
 0x44b   : > { %v1637_v29 = vsel %vm1315_vm6, %v1636_v9, %v1586_v60  ;;  %v3164_v9 = vmov 6  }
 0x44d   : > { %v1598_v3 = vpop.xlane.xlu0 %1597  ;;  %v1888_v21 = vpop.xlane.xlu1 %1887 }
 0x44e   : > { %v1945_v11 = vsel %vm1313_vm5, %v1944_v10, %v1888_v21  ;;  %v1638_v12 = vsel %vm1317_vm7, %v1637_v29, %v1598_v3  ;;  %v3158_v3 = vmov 1   ;;  %v3160_v21 = vmov 2  }
 0x44f   : > { %v1946_v15 = vsel %vm1315_vm6, %v1945_v11, %v1899_v25  ;;  %3018 = vset.pattern.permute.xlu0 %v3158_v3 }
 0x451   : > { %v1910_v28 = vpop.xlane.xlu0 %1909  ;;  %v2196_v7 = vpop.xlane.xlu1 %2195 }
 0x452   : > { %v2253_v16 = vsel %vm1313_vm5, %v2252_v48, %v2196_v7  ;;  %v1947_v18 = vsel %vm1317_vm7, %v1946_v15, %v1910_v28  ;;  %v3161_v7 = vmov 3  }
 0x453   : > { %v2254_v31 = vsel %vm1315_vm6, %v2253_v16, %v2207_v2  ;;  %v3165_v16 = vmov 7  }
 0x455   : > { %v2218_v6 = vpop.xlane.xlu0 %2217  ;;  %v1610_v8 = vpop.xlane.xlu1 %1609 }
 0x456   : > { %v1639_v13 = vsel %vm1319_vm8, %v1638_v12, %v1610_v8  ;;  %v2255_v33 = vsel %vm1317_vm7, %v2254_v31, %v2218_v6  ;;  %v3162_v8 = vmov 4  }
 0x459   : > { %v1634_v17 = vpop.xlane.xlu0 %1633  ;;  %v1921_v38 = vpop.xlane.xlu1 %1920 }
 0x45a   : > { %v1948_v23 = vsel %vm1319_vm8, %v1947_v18, %v1921_v38 }
 0x45d   : > { %v1943_v62 = vpop.xlane.xlu0 %1942  ;;  %v2229_v19 = vpop.xlane.xlu1 %2228 }
 0x45e   : > { %v2256_v37 = vsel %vm1319_vm8, %v2255_v33, %v2229_v19 }
 0x461   : > { %v2251_v43 = vpop.xlane.xlu1 %2250 }
 0x471   : > { %v1622_v39 = vpop.xlane.xlu0 %1621 }
 0x472   : > { %v1640_v14 = vsel %vm1321_vm9, %v1639_v13, %v1622_v39 }
 0x473   : > { %v1641_v49 = vsel %vm1323_vm10, %v1640_v14, %v1634_v17 }
 0x474   : > { %v1717_v22 = vadd.f32 %v3614_v36, %v1641_v49 }
 0x475   : > { %v1932_v24 = vpop.xlane.xlu0 %1931 }
 0x476   : > { %v1949_v26 = vsel %vm1321_vm9, %v1948_v23, %v1932_v24  ;;  %v1720_v27 = vadd.f32 %v3693_v40, %v1717_v22 }
 0x477   : > { %v1950_v32 = vsel %vm1323_vm10, %v1949_v26, %v1943_v62 }
 0x478   : > { %v2026_v34 = vadd.f32 %v3617_v41, %v1950_v32  ;;  %v1721_v35 = vsel %vm1279_vm3, %v1720_v27, -inf }
 0x479   : > { %v2240_v36 = vpop.xlane.xlu0 %2239  ;;  %1722 = vmax.xlane.f32.xlu1 %v1721_v35 }
 0x47a   : > { %v2257_v44 = vsel %vm1321_vm9, %v2256_v37, %v2240_v36  ;;  %v2029_v51 = vadd.f32 %v3693_v40, %v2026_v34 }
 0x47b   : > { %v2258_v53 = vsel %vm1323_vm10, %v2257_v44, %v2251_v43 }
 0x47c   : > { %v2334_v55 = vadd.f32 %v3620_v46, %v2258_v53  ;;  %v2030_v56 = vsel %vm1279_vm3, %v2029_v51, -inf  ;;  %v3159_v46 = vmov 0  }
 0x47d   : > { %v1410_v58 = vpop.xlane.xlu0 %1409  ;;  %2031 = vmax.xlane.f32.xlu0 %v2030_v56  ;;  %3017 = vset.pattern.permute.xlu1 %v3159_v46 }
 0x47e   : > { %v1411_v41 = vsub.f32 %v1407_v47, %v1410_v58  ;;  %v2337_v60 = vadd.f32 %v3693_v40, %v2334_v55 }
 0x480   : > { %v1412_v20 = vmul.f32 1.442695, %v1411_v41  ;;  %v2338_v25 = vsel %vm1279_vm3, %v2337_v60, -inf }
 0x481   : > { %2339 = vmax.xlane.f32.xlu1 %v2338_v25 }
 0x482   : > { %3066 = vpow2.f32 %v1412_v20 }
 0x48c   : > { %v3067_v1 = vpop.eup %3066 }
 0x48d   : > { %v1414_v2 = vsel %vm1279_vm3, %v3067_v1, 0.0 }
 0x48e   : > { %1415 = vadd.xlane.f32.xlu0 %v1414_v2 }
 0x506   : > { %v1723_v10 = vpop.xlane.xlu1 %1722 }
 0x507   : > { %v1724_v29 = vsub.f32 %v1720_v27, %v1723_v10 }
 0x509   : > { %v1725_v11 = vmul.f32 1.442695, %v1724_v29 }
 0x50a   : > { %v2032_v4 = vpop.xlane.xlu0 %2031 }
 0x50b   : > { %v2033_v6 = vsub.f32 %v2029_v51, %v2032_v4 }
 0x50d   : > { %v2034_v17 = vmul.f32 1.442695, %v2033_v6 }
 0x50e   : > { %v2340_v39 = vpop.xlane.xlu1 %2339 }
 0x50f   : > { %v2341_v14 = vsub.f32 %v2337_v60, %v2340_v39 }
 0x511   : > { %v2342_v48 = vmul.f32 1.442695, %v2341_v14 }
 0x51b   : > { %v1416_v28 = vpop.xlane.xlu0 %1415 }
 0x51c   : > { %3068 = vrcp.f32 %v1416_v28 }
 0x51d   : > { %3070 = vpow2.f32 %v2034_v17 }
 0x51e   : > { %3072 = vpow2.f32 %v1725_v11 }
 0x51f   : > { %3074 = vpow2.f32 %v2342_v48 }
 0x526   : > { %v3069_v47 = vpop.eup %3068 }
 0x527   : > { %v1418_v40 = vmul.f32 %v3069_v47, %v3067_v1  ;;  %v3071_v62 = vpop.eup %3070 }
 0x528   : > { %v2036_v38 = vsel %vm1279_vm3, %v3071_v62, 0.0  ;;  %v3073_v12 = vpop.eup %3072 }
 0x529   : > { %1498 = vperm.xlu0 %3018, %v1418_v40   ;;  %2884 = vmatmul.mubr.msk.f32.vlgmr.msra.gmra.mrb[14].mxu1 %vm1279_vm3, %v1418_v40  ;;  %v1727_v13 = vsel %vm1279_vm3, %v3073_v12, 0.0  ;;  %v3746_v15 = vpop.eup %3074 }
 0x52a   : > { %1421 = vperm.xlu1 %3017, %v1418_v40   ;;  %2893 = vmatprep.mubr.msk.f32.mxu1 %vm3150_vm1, %v3151_v5  ;;  %v2344_v49 = vsel %vm1279_vm3, %v3746_v15, 0.0 }
 0x52d   : > { %3025 = vset.pattern.permute.xlu0 %v3159_v46 }
 0x52e   : > { %3019 = vset.pattern.permute.xlu1 %v3160_v21 }
 0x52f   : > { %1504 = vperm.xlu1 %3019, %v1418_v40  }
 0x533   : > { %3020 = vset.pattern.permute.xlu1 %v3161_v7 }
 0x534   : > { %1510 = vperm.xlu1 %3020, %v1418_v40  }
 0x538   : > { %3021 = vset.pattern.permute.xlu1 %v3162_v8 }
 0x539   : > { %1516 = vperm.xlu1 %3021, %v1418_v40  }
 0x53d   : > { %3022 = vset.pattern.permute.xlu1 %v3163_v61 }
 0x53e   : > { %1522 = vperm.xlu1 %3022, %v1418_v40  }
 0x542   : > { %3023 = vset.pattern.permute.xlu1 %v3164_v9 }
 0x548   : > { %2037 = vadd.xlane.f32.xlu0 %v2036_v38 }
 0x55e   : > { %1739 = vrot.lane.b32.xlu0 %v3507_v30, %s3153_s24 }
 0x562   : > { %1728 = vadd.xlane.f32.xlu1 %v1727_v13 }
 0x573   : > { %2047 = vrot.lane.b32.xlu1 %v3507_v30, %s3152_s26 }
 0x597   : > { %2345 = vadd.xlane.f32.xlu1 %v2344_v49 }
 0x5a8   : > { %2355 = vrot.lane.b32.xlu1 %v3507_v30, %s3154_s2  ;;  %v1499_v18 = vpop.permute.xlu0 %1498  ;;  %v3758_v30 = vld [vmem:[%s3947_s12] ss:$0 sm:$0xff] }
 0x5a9   : > { %v1422_v19 = vpop.permute.xlu1 %1421  ;;  %v3762_v33 = vadd.f32 %v3758_v30, %v3533_v45  ;;  %v3766_v35 = vadd.f32 %v3531_v42, %v3758_v30  ;;  %v3771_v51 = vadd.f32 %v3758_v30, %v3539_v52  ;;  %v3777_v42 = vadd.f32 %v3537_v50, %v3758_v30 }
 0x5aa   : > { %v3785_v60 = vadd.f32 %v3758_v30, %v3545_v57  ;;  %v3793_v50 = vadd.f32 %v3543_v54, %v3758_v30  ;;  %v3814_v47 = vadd.f32 %v3758_v30, %v3555_v0 }
 0x5ab   : > { %v1424_v37 = vmul.f32 %v1422_v19, %v3762_v33  ;;  %v1501_v53 = vmul.f32 %v1499_v18, %v3766_v35 }
 0x5ac   : > { %1528 = vperm.xlu1 %3023, %v1418_v40  }
 0x5ae   : > { %v1505_v23 = vpop.permute.xlu1 %1504 }
 0x5af   : > { %v1507_v58 = vmul.f32 %v1505_v23, %v3771_v51 }
 0x5b0   : > { %3024 = vset.pattern.permute.xlu1 %v3165_v16 }
 0x5b1   : > { %1534 = vperm.xlu1 %3024, %v1418_v40  }
 0x5b3   : > { %v1511_v26 = vpop.permute.xlu1 %1510 }
 0x5b4   : > { %v1513_v20 = vmul.f32 %v1511_v26, %v3777_v42 }
 0x5b5   : > { %3026 = vset.pattern.permute.xlu1 %v3158_v3 }
 0x5b8   : > { %v1517_v27 = vpop.permute.xlu1 %1516 }
 0x5b9   : > { %v1519_v1 = vmul.f32 %v1517_v27, %v3785_v60 }
 0x5bd   : > { %v1523_v31 = vpop.permute.xlu1 %1522 }
 0x5be   : > { %v1525_v57 = vmul.f32 %v1523_v31, %v3793_v50 }
 0x5d5   : > { %v2038_v22 = vpop.xlane.xlu0 %2037 }
 0x5d9   : > { %v1740_v24 = vpop.permute.xlu0 %1739 }
 0x5da   : > { %2892 = vmatpush3.msra.mxu1 %v1740_v24 }
 0x5db   : > { %2901 = vmatprep.subr.mxu1 %v3151_v5 }
 0x5ef   : > { %v1729_v32 = vpop.xlane.xlu1 %1728 }
 0x5f0   : > { %3076 = vrcp.f32 %v1729_v32 }
 0x5f1   : > { %3078 = vrcp.f32 %v2038_v22 }
 0x5f3   : > { %v2048_v56 = vpop.permute.xlu1 %2047 }
 0x5fa   : > { %v3077_v34 = vpop.eup %3076 }
 0x5fb   : > { %v1731_v36 = vmul.f32 %v3077_v34, %v3073_v12  ;;  %v3079_v44 = vpop.eup %3078 }
 0x5fc   : > { %v1493_v43 = vpop.f32.mrb[14].mxu1  ;;  %v2040_v52 = vmul.f32 %v3079_v44, %v3071_v62 }
 0x5fd   : > { %v1494_v55 = vadd.f32 %v1493_v43, %v1424_v37  ;;  %1815 = vperm.xlu1 %3026, %v1731_v36   ;;  %1734 = vperm.xlu0 %3025, %v1731_v36   ;;  %v2885_v45 = vpop.f32.mrb[15].mxu1 }
 0x5fe   : > { %2894 = vmatmul.mubr.msk.f32.vlgmr.msra.gmra.mrb[16].mxu1 %vm1279_vm3, %v1731_v36  ;;  %v2489_v45 = vld [vmem:[%s3948_s13 + $0x8] sm:$0xff] }
 0x5ff   : > { %v1502_v41 = vadd.f32 %v1501_v53, %v1494_v55  ;;  %2902 = vmatpush3.msra.mxu1 %v2048_v56  ;;  %2903 = vmatprep.mubr.msk.f32.mxu1 %vm3150_vm1, %v3151_v5  ;;  %v2488_v55 = vld [vmem:[%s3948_s13] sm:$0xff]  ;;  %v2490_v56 = vld [vmem:[%s3948_s13 + $0x10] sm:$0xff] }
 0x600   : > { %2911 = vmatprep.subr.mxu1 %v3151_v5 }
 0x601   : > { %v1508_v25 = vadd.f32 %v1507_v58, %v1502_v41  ;;  %3027 = vset.pattern.permute.xlu1 %v3160_v21  ;;  %3028 = vset.pattern.permute.xlu0 %v3161_v7 }
 0x602   : > { %2904 = vmatmul.mubr.msk.f32.vlgmr.msra.gmra.mrb[18].mxu1 %vm1279_vm3, %v2040_v52  ;;  %1821 = vperm.xlu1 %3027, %v1731_v36  }
 0x603   : > { %v1514_v2 = vadd.f32 %v1513_v20, %v1508_v25  ;;  %1827 = vperm.xlu0 %3028, %v1731_v36   ;;  %2913 = vmatprep.mubr.msk.f32.mxu1 %vm3150_vm1, %v3151_v5  ;;  %v2954_v20 = vpack.c.bf16 %v2489_v45, %v2488_v55  ;;  %v2491_v25 = vld [vmem:[%s3948_s13 + $0x18] sm:$0xff] }
 0x605   : > { %v1520_v4 = vadd.f32 %v1519_v1, %v1514_v2  ;;  %v1274_v1 = vadd.f32 %v3553_v63, %v3758_v30  ;;  %2955 = vmatpush3.bf16.msra.mxu0 %v2954_v20 }
 0x606   : > { %3029 = vset.pattern.permute.xlu1 %v3162_v8  ;;  %2956 = vmatprep.subr.bf16.mxu0 %v3149_v59 }
 0x607   : > { %3031 = vset.pattern.permute.xlu0 %v3164_v9  ;;  %1833 = vperm.xlu1 %3029, %v1731_v36   ;;  %v1526_v28 = vadd.f32 %v1525_v57, %v1520_v4 }
 0x608   : > { %1845 = vperm.xlu0 %3031, %v1731_v36  }
 0x60b   : > { %3030 = vset.pattern.permute.xlu1 %v3163_v61 }
 0x60c   : > { %3034 = vset.pattern.permute.xlu0 %v3158_v3  ;;  %1839 = vperm.xlu1 %3030, %v1731_v36  }
 0x60d   : > { %2123 = vperm.xlu0 %3034, %v2040_v52  }
 0x610   : > { %3032 = vset.pattern.permute.xlu1 %v3165_v16 }
 0x611   : > { %3037 = vset.pattern.permute.xlu0 %v3162_v8  ;;  %1851 = vperm.xlu1 %3032, %v1731_v36  }
 0x612   : > { %2141 = vperm.xlu0 %3037, %v2040_v52  }
 0x615   : > { %3033 = vset.pattern.permute.xlu1 %v3159_v46 }
 0x616   : > { %3040 = vset.pattern.permute.xlu0 %v3165_v16  ;;  %2043 = vperm.xlu1 %3033, %v2040_v52  }
 0x617   : > { %2159 = vperm.xlu0 %3040, %v2040_v52  }
 0x61a   : > { %3035 = vset.pattern.permute.xlu1 %v3160_v21 }
 0x61b   : > { %2129 = vperm.xlu1 %3035, %v2040_v52   ;;  %3043 = vset.pattern.permute.xlu0 %v3160_v21 }
 0x61f   : > { %3036 = vset.pattern.permute.xlu1 %v3161_v7 }
 0x620   : > { %2135 = vperm.xlu1 %3036, %v2040_v52  }
 0x624   : > { %3038 = vset.pattern.permute.xlu1 %v3163_v61  ;;  %v2346_v5 = vpop.xlane.xlu1 %2345 }
 0x625   : > { %3080 = vrcp.f32 %v2346_v5  ;;  %2147 = vperm.xlu1 %3038, %v2040_v52   ;;  %v2957_v5 = vpack.c.bf16 %v2491_v25, %v2490_v56 }
 0x627   : > { %2958 = vmatpush3.bf16.msra.mxu0 %v2957_v5  ;;  %v2748_v5 = vld [vmem:[%s3952_s17] ss:$0 sm:$0xff] }
 0x628   : > { %v2356_v54 = vpop.permute.xlu1 %2355 }
 0x629   : > { %3039 = vset.pattern.permute.xlu1 %v3164_v9  ;;  %2912 = vmatpush3.msra.mxu1 %v2356_v54 }
 0x62a   : > { %2153 = vperm.xlu1 %3039, %v2040_v52  }
 0x62c   : > { %v1529_v40 = vpop.permute.xlu1 %1528 }
 0x62d   : > { %v1531_v21 = vmul.f32 %v1529_v40, %v3814_v47 }
 0x62e   : > { %3041 = vset.pattern.permute.xlu1 %v3159_v46 }
 0x62f   : > { %v3081_v6 = vpop.eup %3080  ;;  %v3818_v17 = vadd.f32 %v1531_v21, %v1526_v28 }
 0x630   : > { %v2348_v62 = vmul.f32 %v3081_v6, %v3746_v15  ;;  %v3829_v0 = vpop.permute.xlu1 %1534 }
 0x632   : > { %2437 = vperm.xlu0 %3043, %v2348_v62   ;;  %2351 = vperm.xlu1 %3041, %v2348_v62  }
 0x633   : > { %2914 = vmatmul.mubr.msk.f32.vlgmr.msra.gmra.mrb[20].mxu1 %vm1279_vm3, %v2348_v62 }
 0x636   : > { %3046 = vset.pattern.permute.xlu0 %v3163_v61  ;;  %3042 = vset.pattern.permute.xlu1 %v3158_v3 }
 0x637   : > { %2455 = vperm.xlu0 %3046, %v2348_v62   ;;  %2431 = vperm.xlu1 %3042, %v2348_v62  }
 0x63b   : > { %3044 = vset.pattern.permute.xlu1 %v3161_v7  ;;  %3049 = vset.pattern.permute.xlu0 %v3165_v16 }
 0x63c   : > { %2443 = vperm.xlu1 %3044, %v2348_v62  }
 0x640   : > { %3045 = vset.pattern.permute.xlu1 %v3162_v8 }
 0x641   : > { %2449 = vperm.xlu1 %3045, %v2348_v62  }
 0x645   : > { %3047 = vset.pattern.permute.xlu1 %v3164_v9 }
 0x646   : > { %2461 = vperm.xlu1 %3047, %v2348_v62  }
 0x64a   : > { %3048 = vset.pattern.permute.xlu1 %v3165_v16 }
 0x64b   : > { %2467 = vperm.xlu1 %3048, %v2348_v62  }
 0x67c   : > { %v1816_v46 = vpop.permute.xlu1 %1815  ;;  %v1735_v7 = vpop.permute.xlu0 %1734 }
 0x67d   : > { %v1737_v8 = vmul.f32 %v1735_v7, %v3762_v33  ;;  %v1818_v14 = vmul.f32 %v1816_v46, %v3766_v35 }
 0x681   : > { %v1822_v3 = vpop.permute.xlu1 %1821 }
 0x682   : > { %v1828_v11 = vpop.permute.xlu0 %1827  ;;  %v1824_v16 = vmul.f32 %v1822_v3, %v3771_v51 }
 0x683   : > { %v1830_v23 = vmul.f32 %v1828_v11, %v3777_v42 }
 0x686   : > { %v1834_v61 = vpop.permute.xlu1 %1833 }
 0x687   : > { %v1846_v13 = vpop.permute.xlu0 %1845  ;;  %v1836_v34 = vmul.f32 %v1834_v61, %v3785_v60 }
 0x688   : > { %v1848_v2 = vmul.f32 %v1846_v13, %v3814_v47 }
 0x68b   : > { %v1840_v38 = vpop.permute.xlu1 %1839 }
 0x68c   : > { %v2124_v49 = vpop.permute.xlu0 %2123  ;;  %v1842_v44 = vmul.f32 %v1840_v38, %v3793_v50 }
 0x68d   : > { %v2126_v24 = vmul.f32 %v2124_v49, %v3766_v35 }
 0x690   : > { %v1852_v10 = vpop.permute.xlu1 %1851 }
 0x691   : > { %v2142_v53 = vpop.permute.xlu0 %2141  ;;  %v1854_v40 = vmul.f32 %v1852_v10, %v1274_v1 }
 0x692   : > { %v2144_v57 = vmul.f32 %v2142_v53, %v3785_v60 }
 0x695   : > { %v2044_v29 = vpop.permute.xlu1 %2043 }
 0x696   : > { %v2046_v18 = vmul.f32 %v2044_v29, %v3762_v33  ;;  %v2160_v46 = vpop.permute.xlu0 %2159 }
 0x697   : > { %v2162_v61 = vmul.f32 %v2160_v46, %v1274_v1 }
 0x69a   : > { %v2130_v12 = vpop.permute.xlu1 %2129 }
 0x69b   : > { %v2132_v37 = vmul.f32 %v2130_v12, %v3771_v51 }
 0x69f   : > { %v2136_v39 = vpop.permute.xlu1 %2135 }
 0x6a0   : > { %v2138_v58 = vmul.f32 %v2136_v39, %v3777_v42 }
 0x6a4   : > { %v2148_v32 = vpop.permute.xlu1 %2147 }
 0x6a5   : > { %v2150_v21 = vmul.f32 %v2148_v32, %v3793_v50 }
 0x6a9   : > { %v2154_v54 = vpop.permute.xlu1 %2153 }
 0x6aa   : > { %v2156_v3 = vmul.f32 %v2154_v54, %v3814_v47 }
 0x6b1   : > { %v2352_v29 = vpop.permute.xlu1 %2351  ;;  %v2438_v13 = vpop.permute.xlu0 %2437 }
 0x6b2   : > { %v2354_v12 = vmul.f32 %v2352_v29, %v3762_v33 }
 0x6b6   : > { %v2432_v59 = vpop.permute.xlu1 %2431 }
 0x6b7   : > { %v2434_v39 = vmul.f32 %v2432_v59, %v3766_v35 }
 0x6bb   : > { %v2444_v10 = vpop.permute.xlu1 %2443 }
 0x6c0   : > { %v2450_v11 = vpop.permute.xlu1 %2449 }
 0x6c5   : > { %v2462_v49 = vpop.permute.xlu1 %2461 }
 0x6d1   : > { %v1810_v9 = vpop.f32.mrb[16].mxu1 }
 0x6d2   : > { %v1811_v48 = vadd.f32 %v1810_v9, %v1737_v8  ;;  %v2895_v15 = vpop.f32.mrb[17].mxu1 }
 0x6d4   : > { %v1819_v19 = vadd.f32 %v1818_v14, %v1811_v48  ;;  %v2440_v48 = vmul.f32 %v2438_v13, %v3771_v51  ;;  %v1537_v51 = vmul.f32 %v3829_v0, %v1274_v1 }
 0x6d5   : > { %v2118_v22 = vpop.f32.mrb[18].mxu1 }
 0x6d6   : > { %v1825_v26 = vadd.f32 %v1824_v16, %v1819_v19  ;;  %v2119_v27 = vadd.f32 %v2118_v22, %v2046_v18  ;;  %v2905_v31 = vpop.f32.mrb[19].mxu1  ;;  %v2446_v16 = vmul.f32 %v2444_v10, %v3777_v42  ;;  %v2456_v19 = vpop.permute.xlu0 %2455  ;;  %v2452_v22 = vmul.f32 %v2450_v11, %v3785_v60 }
 0x6d8   : > { %v1831_v36 = vadd.f32 %v1830_v23, %v1825_v26  ;;  %v2127_v43 = vadd.f32 %v2126_v24, %v2119_v27  ;;  %v2458_v24 = vmul.f32 %v2456_v19, %v3793_v50  ;;  %v2468_v26 = vpop.permute.xlu1 %2467  ;;  %v2464_v27 = vmul.f32 %v2462_v49, %v3814_v47 }
 0x6d9   : > { %v2470_v31 = vmul.f32 %v2468_v26, %v1274_v1 }
 0x6da   : > { %v1837_v41 = vadd.f32 %v1836_v34, %v1831_v36  ;;  %v2133_v52 = vadd.f32 %v2132_v37, %v2127_v43  ;;  %v1538_v37 = vadd.f32 %v1537_v51, %v3818_v17  ;;  %v3084_v17 = vld [vmem:[%s3403_s0] sm:$0xff] }
 0x6dc   : > { %v1843_v4 = vadd.f32 %v1842_v44, %v1837_v41  ;;  %v2139_v28 = vadd.f32 %v2138_v58, %v2133_v52  ;;  %v2746_v44 = vld [vmem:[%s3949_s14] ss:$0 sm:$0xff] }
 0x6de   : > { %v2145_v6 = vadd.f32 %v2144_v57, %v2139_v28  ;;  %v1849_v62 = vadd.f32 %v1848_v2, %v1843_v4 }
 0x6e0   : > { %v2151_v63 = vadd.f32 %v2150_v21, %v2145_v6  ;;  %v1855_v30 = vadd.f32 %v1854_v40, %v1849_v62  ;;  %v2749_v40 = vld [vmem:[%s3953_s18] ss:$0 sm:$0xff] }
 0x6e2   : > { %2473 = vrot.lane.b32.xlu0 %v1855_v30, %s3155_s20  ;;  %v2157_v38 = vadd.f32 %v2156_v3, %v2151_v63 }
 0x6e4   : > { %v2163_v7 = vadd.f32 %v2162_v61, %v2157_v38 }
 0x6e6   : > { %2477 = vrot.lane.b32.xlu1 %v2163_v7, %s3156_s21  ;;  %s3892_s21 = scalar_lea.hbm %s3954_s19, %s2751_s22 }
 0x706   : > { %v2426_v8 = vpop.f32.mrb[20].mxu1 }
 0x707   : > { %v2427_v9 = vadd.f32 %v2426_v8, %v2354_v12  ;;  %v2915_v14 = vpop.f32.mrb[21].mxu1 }
 0x709   : > { %v2435_v15 = vadd.f32 %v2434_v39, %v2427_v9 }
 0x70b   : > { %v2441_v18 = vadd.f32 %v2440_v48, %v2435_v15 }
 0x70d   : > { %v2447_v23 = vadd.f32 %v2446_v16, %v2441_v18 }
 0x70f   : > { %v2453_v33 = vadd.f32 %v2452_v22, %v2447_v23 }
 0x711   : > { %v2459_v35 = vadd.f32 %v2458_v24, %v2453_v33 }
 0x713   : > { %v2465_v32 = vadd.f32 %v2464_v27, %v2459_v35 }
 0x715   : > { %v2471_v34 = vadd.f32 %v2470_v31, %v2465_v32 }
 0x717   : > { %2481 = vrot.lane.b32.xlu0 %v2471_v34, %s3157_s25  ;;  %s617_s25 = sand.u32 1, %s3139_s30  }
 0x718   : > { %s2703_s24 = sshll.u32 %s617_s25, 3  ;;  %s2606_s0 = scalar_lea.sflag [#allocation3], %s617_s25 }
 0x719   : > { %s619_s23 = scalar_lea.vmem [#allocation2], %s2703_s24  ;;  %s3089_s24 = sshll.u32 %s3166_s1, 4  ;;  %s3090_s24 = int_to_ptr.vmem [resolvable:$false] %s3089_s24 }
 0x71a   : > { %s2619_s27 = sshll.u32 %s619_s23, 4  ;;  %s3091_s28 = scalar_lea.vmem %s3090_s24, 256  ;;  %s3894_s27 = int_to_ptr.vmem [resolvable:$true] %s2619_s27 }
 0x71b   : > { %s3085_s2 = scalar_lea.vmem %s3894_s27, 128  ;;  %p3092_p0 = scmp.lt.s32.totalorder %s3894_s27, %s3090_s24 }
 0x71c   : > { %p3086_p11 = scmp.ne.s32.totalorder %s3894_s27, %s3085_s2  ;;  %p3093_p1 = scmp.lt.s32.totalorder %s3091_s28, %s3085_s2 }
 0x71e   : > { %p3087_p12 = pnand %p3086_p11, %p3305_p5  ;;  %p3094_p2 = por %p3093_p1, %p3092_p0 }
 0x720   : > { %p3088_p13 = pneg %p3087_p12 }
 0x722   : > { %p3095_p3 = pnand %p3094_p2, %p3088_p13 }
 0x754   : > { %v2474_v42 = vpop.permute.xlu0 %2473 }
 0x755   : > { %v2484_v50 = vsel %vm1279_vm3, %v1538_v37, %v2474_v42 }
 0x758   : > { %v2478_v60 = vpop.permute.xlu1 %2477 }
 0x759   : > { %v2485_v36 = vsel %vm889_vm0, %v2484_v50, %v2478_v60 }
 0x789   : > { %v2482_v43 = vpop.permute.xlu0 %2481 }
 0x78a   : > { %v2487_v47 = vsel %vm2486_vm11, %v2485_v36, %v2482_v43 }
 0x78b   : > { %2925 = vmatmul.mubr.msk.f32.vlgmr.msra.gmra.mrb[16].mxu0 %vm644_vm2, %v2487_v47 }
 0x85e   : > { %v2568_v53 = vpop.f32.mrb[16].mxu0 }
 0x85f   : > { %v2569_v55 = vadd.f32 %v2746_v44, %v2568_v53  ;;  %v2926_v0 = vpop.f32.mrb[17].mxu0 }
 0x861   : > { %v2572_v45 = vmax.f32 %v2569_v55, 0.0 }
 0x863   : > { %v2573_v56 = vadd.f32 %v3084_v17, %v2572_v45 }
 0x865   : > { %v2574_v58 = vsel %vm644_vm2, %v2573_v56, 0.0 }
 0x866   : > { %2575 = vadd.xlane.f32.xlu1 %v2574_v58 }
 0x8f3   : > { %v2576_v41 = vpop.xlane.xlu1 %2575 }
 0x8f4   : > { %v2578_v52 = vmul.f32 0.03125, %v2576_v41 }
 0x8f6   : > { %v2579_v20 = vsub.f32 %v2573_v56, %v2578_v52 }
 0x8f8   : > { %v2580_v25 = vmul.f32 %v2579_v20, %v2579_v20 }
 0x8fa   : > { %v2581_v1 = vsel %vm644_vm2, %v2580_v25, 0.0 }
 0x8fb   : > { %2582 = vadd.xlane.f32.xlu0 %v2581_v1 }
 0x988   : > { %v2583_v2 = vpop.xlane.xlu0 %2582 }
 0x989   : > { %v2584_v57 = vmul.f32 0.03125, %v2583_v2 }
 0x98b   : > { %v2585_v4 = vadd.f32 1e-05, %v2584_v57 }
 0x98d   : > { %3082 = vrsqrt.f32 %v2585_v4 }
 0x997   : > { %v3083_v28 = vpop.eup %3082 }
 0x998   : > { %v2587_v54 = vmul.f32 %v3083_v28, %v2579_v20 }
 0x99a   : > { %v2595_v21 = vmul.f32 %v2748_v5, %v2587_v54 }
 0x99c   : > { %v2603_v6 = vadd.f32 %v2749_v40, %v2595_v21 }
 0x99e   : > { %2604 = vst.msk [vmem:[%s619_s23] sm:$0xff] %vm644_vm2, %v2603_v6 }
 0x99f   : > { %3098 = shalt.err (!%p3095_p3)
}
 0x9a0   : > { %s3099_s25 = scalar_lea.hbm %s3892_s21, 128  ;;  %s3103_s23 = scalar_lea.hbm %s3954_s19, 256 }
 0x9a1   : > { %p3100_p4 = scmp.ne.s32.totalorder %s3892_s21, %s3099_s25  ;;  %p3104_p9 = scmp.lt.u32.totalorder %s3892_s21, %s3954_s19 }
 0x9a2   : > { %p3105_p10 = scmp.lt.u32.totalorder %s3103_s23, %s3099_s25  ;;  %p3107_p12 = scmp.lt.u32.totalorder %s3099_s25, %s3892_s21 }
 0x9a3   : > { %p3101_p7 = pnand %p3100_p4, %p3305_p5 }
 0x9a4   : > { %p3106_p11 = por %p3105_p10, %p3104_p9 }
 0x9a5   : > { %p3102_p8 = pneg %p3101_p7 }
 0x9a6   : > { %p3108_p13 = por %p3107_p12, %p3106_p11 }
 0x9a8   : > { %p3109_p0 = pnand %p3108_p13, %p3102_p8 }
 0x9aa   : > { %3112 = shalt.err (!%p3109_p0)
}
 0x9ab   : > { %2961 = dma.vmem_to_hbm [thread:$0]  (%p3305_p5), %s3894_s27, 128, %s3892_s21, %s2606_s0  }
 0x9ac PF: > { %s3980_s2 = sld [smem:[#allocation7_spill]]  ;;  %s3981_s1 = sld [smem:[#allocation5_spill]] }
 0x9b2   : > { %p2967_p1 = scmp.ge.s32.totalorder %s3980_s2, 2  ;;  %s2631_s28 = sand.u32 1, %s3981_s1  }
 0x9b3   : > { %s2632_s29 = scalar_lea.sflag [#allocation3], %s2631_s28 }
 0x9b4   : > { %p2964_p2 = pnand %p2967_p1, %p3309_p6 }
 0x9b6   : > { %3130 = dma.done.wait (!%p2964_p2), %s2632_s29, 128  }
 0x9b7   : > { %3132 = vsyncadd (!%p2964_p2), %s2632_s29, 4294967168  ;;  %s3983_s21 = sld [smem:[#allocation8_spill]]  ;;  %s3984_s25 = sld [smem:[#allocation6_spill]] }
 0x9b8   : > { %s3985_s20 = sld [smem:[#allocation9_spill]]  ;;  %s3986_s0 = smov %s3139_s30 }
 0x9bd   : > { %p29_p3 = scmp.ge.s32.totalorder %s3983_s21, 4   ;;  %s3987_s30 = smov %s3984_s25 }
 0x9bf   :  { %31 = sbr.rel (!%p29_p3) target bundleno = 8 (0x8), region = 137 }
 0x9c6   :  { %2637 = vsyncpa [#allocation3], 1 }
 0x9c7   :  { %2639 = vsyncpa [#allocation3 + $0x1], 1 }

</bundles_post_ra>
